<compile_context>
chip_gen: v7x
topology: tpu7x:2x2x1
jax: 0.10.0
libtpu: 0.0.40
codegen_flags: <defaults>
</compile_context>

<pallas_src>
import functools

import jax
import jax.numpy as jnp
from jax.experimental import pallas as pl
from jax.experimental.pallas import tpu as pltpu


def _pick_toh(oh, ow, cout):
    """Output-row tile: TOH | OH, lane-dense pixel block (TOH*OW % 128 == 0),
    bounded f32 accumulator (<= ~128 KiB), and >= 2 tiles when possible so the
    grid has parallel blocks for both v7x TensorCores."""
    max_rows = max(128, min(2048, (128 * 1024) // (4 * max(cout, 1))))
    best_single = None
    for cand in range(oh, 0, -1):
        if oh % cand:
            continue
        rows = cand * ow
        if rows % 128 or rows > max_rows:
            continue
        if oh // cand >= 2:
            return cand
        if best_single is None:
            best_single = cand
    if best_single is not None:
        return best_single
    return oh   # fallback: whole image (block == full pixel dim)


def _pick_tp(p, cout, max_bytes=4 << 20):
    """Pixel tile for the BN-apply pass: whole pixel dim when small (no forced
    multi-step grid), otherwise the largest 128-multiple divisor under the
    byte cap."""
    if p * cout * 4 <= max_bytes or p % 128 != 0:
        return p
    cap = max(128, ((max_bytes // (cout * 4)) // 128) * 128)
    for cand in range(min(cap, p), 127, -128):
        if p % cand == 0:
            return cand
    return p


# --------------------------------------------------------------------------- #
# Kernel 1: direct conv (in-kernel patch build, single K=KH*KW*Cin dot)       #
#           + per-tile partial BN statistics, lane-dense channel-major store. #
# --------------------------------------------------------------------------- #
def _conv_stats_kernel(x_ref, w_ref, out_ref, stats_ref, *,
                       toh, ow, kh_sz, kw_sz, stride, cin):
    t = pl.program_id(1)
    oh0 = pl.multiple_of(t * toh, toh)

    # KH*KW shifted windows, concatenated along channels -> (toh, ow, KH*KW*Cin).
    slices = []
    for kh in range(kh_sz):
        for kw in range(kw_sz):
            if stride == 1:
                hs = pl.ds(oh0 + kh, toh)
                ws = pl.ds(kw, ow)
            else:
                hs = pl.ds(oh0 * stride + kh, toh, stride)
                ws = pl.ds(kw, ow, stride)
            slices.append(x_ref[0, hs, ws, :])
    patch = jnp.concatenate(slices, axis=-1)
    patch = patch.reshape(toh * ow, kh_sz * kw_sz * cin)     # leading-dim merge

    # Single MXU contraction, f32 accumulation.
    acc = jnp.dot(patch, w_ref[...], preferred_element_type=jnp.float32)

    # Partial BN statistics while the tile is still live in VMEM (f32).
    s = jnp.sum(acc, axis=0, keepdims=True)                   # (1, Cout)
    ss = jnp.sum(acc * acc, axis=0, keepdims=True)            # (1, Cout)
    stats_ref[0, 0] = jnp.concatenate([s, ss], axis=0)        # (2, Cout)

    # Channel-major, lane-dense bf16 writeback: (Cout, TOH*OW).
    out_ref[0] = jnp.transpose(acc).astype(out_ref.dtype)


# --------------------------------------------------------------------------- #
# Kernel 2: BatchNorm apply + LeakyReLU on the channel-major intermediate.    #
# --------------------------------------------------------------------------- #
def _bn_leaky_kernel(x_ref, scale_ref, shift_ref, o_ref, *, slope):
    y = x_ref[...].astype(jnp.float32) * scale_ref[...] + shift_ref[...]
    o_ref[...] = jnp.where(y >= 0, y, slope * y)


def conv_layer_forward(x_nchw, w, b, gamma, beta, *, stride, padding,
                       eps=1e-5, slope=0.1):
    # Conv bias cancels exactly under train-mode BatchNorm (batch-mean subtract).
    del b

    N, Cin, H, W = x_nchw.shape
    Cout, _, KH, KW = w.shape
    OH = (H + 2 * padding - KH) // stride + 1
    OW = (W + 2 * padding - KW) // stride + 1
    P = OH * OW
    M = N * P
    K = KH * KW * Cin

    # ---- glue: NCHW -> padded NHWC (cin on lanes for the patch build), bf16 --
    x = jnp.transpose(x_nchw, (0, 2, 3, 1)).astype(jnp.bfloat16)
    x = jnp.pad(x, ((0, 0), (padding, padding), (padding, padding), (0, 0)))
    Hp, Wp = H + 2 * padding, W + 2 * padding

    # PyTorch weight (Cout, Cin, KH, KW) -> (KH*KW*Cin, Cout) matching the
    # in-kernel patch ordering (kh, kw, cin), bf16 for the MXU.
    w_mat = jnp.transpose(w, (2, 3, 1, 0)).reshape(K, Cout).astype(jnp.bfloat16)

    # ---- Pallas kernel 1: conv + partial stats ------------------------------
    TOH = _pick_toh(OH, OW, Cout)
    num_t = OH // TOH
    TP = TOH * OW

    kern1 = functools.partial(_conv_stats_kernel, toh=TOH, ow=OW,
                              kh_sz=KH, kw_sz=KW, stride=stride, cin=Cin)

    blk_bytes = 2 * (Hp * Wp * Cin * 2 + K * Cout * 2 + Cout * TP * 2
                     + 2 * Cout * 4)                     # double-buffered blocks
    vmem_limit = int(min(64 << 20, max(8 << 20, 4 * blk_bytes)))
    flops = 2 * M * K * Cout
    bytes_accessed = (N * Hp * Wp * Cin * 2 + K * Cout * 2
                      + M * Cout * 2 + N * num_t * 2 * Cout * 4)

    conv_cm, stats = pl.pallas_call(
        kern1,
        out_shape=(
            jax.ShapeDtypeStruct((N, Cout, P), jnp.bfloat16),
            jax.ShapeDtypeStruct((N, num_t, 2, Cout), jnp.float32),
        ),
        grid=(N, num_t),
        in_specs=[
            pl.BlockSpec((1, Hp, Wp, Cin), lambda n, t: (n, 0, 0, 0)),
            pl.BlockSpec((K, Cout), lambda n, t: (0, 0)),
        ],
        out_specs=(
            pl.BlockSpec((1, Cout, TP), lambda n, t: (n, 0, t)),
            pl.BlockSpec((1, 1, 2, Cout), lambda n, t: (n, t, 0, 0)),
        ),
        compiler_params=pltpu.CompilerParams(
            dimension_semantics=("parallel", "parallel"),
            vmem_limit_bytes=vmem_limit),
        cost_estimate=pl.CostEstimate(flops=flops, transcendentals=0,
                                      bytes_accessed=bytes_accessed),
    )(x, w_mat)

    # ---- tiny XLA reduction over (N, num_t, 2, Cout) partials ----------------
    ch_sum = jnp.sum(stats[:, :, 0, :], axis=(0, 1))              # (Cout,)
    ch_sumsq = jnp.sum(stats[:, :, 1, :], axis=(0, 1))
    mean = ch_sum / M
    # NOTE: E[x^2] - E[x]^2 in f32; fine at this tolerance, a shifted/Welford
    # formulation is safer when |mean| >> std.
    var = jnp.maximum(ch_sumsq / M - mean * mean, 0.0)            # biased var
    inv_std = jax.lax.rsqrt(var + eps)
    scale = (gamma.astype(jnp.float32) * inv_std).reshape(Cout, 1)
    shift = (beta.astype(jnp.float32) - mean * gamma.astype(jnp.float32)
             * inv_std).reshape(Cout, 1)

    # ---- Pallas kernel 2: BN apply + LeakyReLU (channel-major, lane-dense) --
    TP2 = _pick_tp(P, Cout)
    n_tp = P // TP2

    y = pl.pallas_call(
        functools.partial(_bn_leaky_kernel, slope=slope),
        out_shape=jax.ShapeDtypeStruct((N, Cout, P), jnp.float32),
        grid=(N, n_tp),
        in_specs=[
            pl.BlockSpec((1, Cout, TP2), lambda n, j: (n, 0, j)),
            pl.BlockSpec((Cout, 1), lambda n, j: (0, 0)),
            pl.BlockSpec((Cout, 1), lambda n, j: (0, 0)),
        ],
        out_specs=pl.BlockSpec((1, Cout, TP2), lambda n, j: (n, 0, j)),
        compiler_params=pltpu.CompilerParams(
            dimension_semantics=("parallel", "parallel")),
    )(conv_cm, scale, shift)

    # Channel-major intermediate == NCHW layout: final result is a free reshape.
    return y.reshape(N, Cout, OH, OW)


def _reference(x_nchw, w, b, gamma, beta, *, stride, padding, eps=1e-5, slope=0.1):
    out = jax.lax.conv_general_dilated(
        x_nchw, w, window_strides=(stride, stride),
        padding=[(padding, padding), (padding, padding)],
        dimension_numbers=("NCHW", "OIHW", "NCHW"))
    out = out + b[None, :, None, None]
    mean = jnp.mean(out, axis=(0, 2, 3), keepdims=True)
    var = jnp.mean((out - mean) ** 2, axis=(0, 2, 3), keepdims=True)
    xhat = (out - mean) * jax.lax.rsqrt(var + eps)
    y = gamma[None, :, None, None] * xhat + beta[None, :, None, None]
    return jnp.where(y >= 0, y, slope * y)


if __name__ == "__main__":
    # ConvLayer(in_channels=4, out_channels=8, kernel_size=3, stride=1, padding=1)
    in_channels, out_channels, kernel_size, stride, padding = 4, 8, 3, 1, 1
    N, H, W = 2, 16, 16

    key = jax.random.PRNGKey(0)
    kx, kwt, kb, kg, kbt = jax.random.split(key, 5)

    x = jax.random.normal(kx, (N, in_channels, H, W), dtype=jnp.float32)
    w = 0.1 * jax.random.normal(
        kwt, (out_channels, in_channels, kernel_size, kernel_size),
        dtype=jnp.float32)
    b = 0.1 * jax.random.normal(kb, (out_channels,), dtype=jnp.float32)
    gamma = 1.0 + 0.1 * jax.random.normal(kg, (out_channels,), dtype=jnp.float32)
    beta = 0.1 * jax.random.normal(kbt, (out_channels,), dtype=jnp.float32)

    out = conv_layer_forward(x, w, b, gamma, beta, stride=stride, padding=padding)
    out = jax.block_until_ready(out)

    ref = _reference(x, w, b, gamma, beta, stride=stride, padding=padding)
    assert out.shape == (N, out_channels, H, W), out.shape
    err = float(jnp.max(jnp.abs(out - ref)))
    # bf16 MXU operands + bf16 intermediate (f32 accumulation/statistics).
    assert err < 5e-2, err

    print("KERNEL_OK")
</pallas_src>

<mosaic_0001>
module attributes {stable_mosaic.version = 11 : i64} {
  func.func @_conv_stats_kernel(%arg0: i32, %arg1: i32, %arg2: memref<1x18x18x4xbf16, #tpu.memory_space<vmem>>, %arg3: memref<36x8xbf16, #tpu.memory_space<vmem>>, %arg4: memref<1x8x128xbf16, #tpu.memory_space<vmem>>, %arg5: memref<1x1x2x8xf32, #tpu.memory_space<vmem>>) attributes {dimension_semantics = [#tpu.dimension_semantics<parallel>, #tpu.dimension_semantics<parallel>], iteration_bounds = array<i64: 2, 2>, scalar_prefetch = 0 : i64, scratch_operands = 0 : i64, tpu.core_type = #tpu.core_type<tc>, window_params = [{transform_indices = @transform_0, window_bounds = array<i64: 1, 18, 18, 4>}, {pipeline_mode = #tpu.pipeline_mode<synchronous>, transform_indices = @transform_1, window_bounds = array<i64: 36, 8>}, {transform_indices = @transform_2, window_bounds = array<i64: 1, 8, 128>}, {transform_indices = @transform_3, window_bounds = array<i64: 1, 1, 2, 8>}]} {
    %c8_i32 = arith.constant 8 : i32
    %0 = arith.muli %arg1, %c8_i32 : i32
    %1 = tpu.assume_multiple %0, 8 : i32
    %c0_i32 = arith.constant 0 : i32
    %2 = arith.addi %1, %c0_i32 : i32
    %c0 = arith.constant 0 : index
    %3 = arith.index_cast %2 : i32 to index
    %c0_0 = arith.constant 0 : index
    %c0_1 = arith.constant 0 : index
    %4 = vector.load %arg2[%c0, %3, %c0_0, %c0_1] : memref<1x18x18x4xbf16, #tpu.memory_space<vmem>>, vector<1x8x16x4xbf16>
    %5 = vector.shape_cast %4 : vector<1x8x16x4xbf16> to vector<8x16x4xbf16>
    %c0_i32_2 = arith.constant 0 : i32
    %6 = arith.addi %1, %c0_i32_2 : i32
    %c0_3 = arith.constant 0 : index
    %7 = arith.index_cast %6 : i32 to index
    %c1 = arith.constant 1 : index
    %c0_4 = arith.constant 0 : index
    %8 = vector.load %arg2[%c0_3, %7, %c1, %c0_4] : memref<1x18x18x4xbf16, #tpu.memory_space<vmem>>, vector<1x8x16x4xbf16>
    %9 = vector.shape_cast %8 : vector<1x8x16x4xbf16> to vector<8x16x4xbf16>
    %c0_i32_5 = arith.constant 0 : i32
    %10 = arith.addi %1, %c0_i32_5 : i32
    %c0_6 = arith.constant 0 : index
    %11 = arith.index_cast %10 : i32 to index
    %c2 = arith.constant 2 : index
    %c0_7 = arith.constant 0 : index
    %12 = vector.load %arg2[%c0_6, %11, %c2, %c0_7] : memref<1x18x18x4xbf16, #tpu.memory_space<vmem>>, vector<1x8x16x4xbf16>
    %13 = vector.shape_cast %12 : vector<1x8x16x4xbf16> to vector<8x16x4xbf16>
    %c1_i32 = arith.constant 1 : i32
    %14 = arith.addi %1, %c1_i32 : i32
    %c0_8 = arith.constant 0 : index
    %15 = arith.index_cast %14 : i32 to index
    %c0_9 = arith.constant 0 : index
    %c0_10 = arith.constant 0 : index
    %16 = vector.load %arg2[%c0_8, %15, %c0_9, %c0_10] : memref<1x18x18x4xbf16, #tpu.memory_space<vmem>>, vector<1x8x16x4xbf16>
    %17 = vector.shape_cast %16 : vector<1x8x16x4xbf16> to vector<8x16x4xbf16>
    %c1_i32_11 = arith.constant 1 : i32
    %18 = arith.addi %1, %c1_i32_11 : i32
    %c0_12 = arith.constant 0 : index
    %19 = arith.index_cast %18 : i32 to index
    %c1_13 = arith.constant 1 : index
    %c0_14 = arith.constant 0 : index
    %20 = vector.load %arg2[%c0_12, %19, %c1_13, %c0_14] : memref<1x18x18x4xbf16, #tpu.memory_space<vmem>>, vector<1x8x16x4xbf16>
    %21 = vector.shape_cast %20 : vector<1x8x16x4xbf16> to vector<8x16x4xbf16>
    %c1_i32_15 = arith.constant 1 : i32
    %22 = arith.addi %1, %c1_i32_15 : i32
    %c0_16 = arith.constant 0 : index
    %23 = arith.index_cast %22 : i32 to index
    %c2_17 = arith.constant 2 : index
    %c0_18 = arith.constant 0 : index
    %24 = vector.load %arg2[%c0_16, %23, %c2_17, %c0_18] : memref<1x18x18x4xbf16, #tpu.memory_space<vmem>>, vector<1x8x16x4xbf16>
    %25 = vector.shape_cast %24 : vector<1x8x16x4xbf16> to vector<8x16x4xbf16>
    %c2_i32 = arith.constant 2 : i32
    %26 = arith.addi %1, %c2_i32 : i32
    %c0_19 = arith.constant 0 : index
    %27 = arith.index_cast %26 : i32 to index
    %c0_20 = arith.constant 0 : index
    %c0_21 = arith.constant 0 : index
    %28 = vector.load %arg2[%c0_19, %27, %c0_20, %c0_21] : memref<1x18x18x4xbf16, #tpu.memory_space<vmem>>, vector<1x8x16x4xbf16>
    %29 = vector.shape_cast %28 : vector<1x8x16x4xbf16> to vector<8x16x4xbf16>
    %c2_i32_22 = arith.constant 2 : i32
    %30 = arith.addi %1, %c2_i32_22 : i32
    %c0_23 = arith.constant 0 : index
    %31 = arith.index_cast %30 : i32 to index
    %c1_24 = arith.constant 1 : index
    %c0_25 = arith.constant 0 : index
    %32 = vector.load %arg2[%c0_23, %31, %c1_24, %c0_25] : memref<1x18x18x4xbf16, #tpu.memory_space<vmem>>, vector<1x8x16x4xbf16>
    %33 = vector.shape_cast %32 : vector<1x8x16x4xbf16> to vector<8x16x4xbf16>
    %c2_i32_26 = arith.constant 2 : i32
    %34 = arith.addi %1, %c2_i32_26 : i32
    %c0_27 = arith.constant 0 : index
    %35 = arith.index_cast %34 : i32 to index
    %c2_28 = arith.constant 2 : index
    %c0_29 = arith.constant 0 : index
    %36 = vector.load %arg2[%c0_27, %35, %c2_28, %c0_29] : memref<1x18x18x4xbf16, #tpu.memory_space<vmem>>, vector<1x8x16x4xbf16>
    %37 = vector.shape_cast %36 : vector<1x8x16x4xbf16> to vector<8x16x4xbf16>
    %38 = tpu.concatenate %5, %9, %13, %17, %21, %25, %29, %33, %37 in 2 : vector<8x16x4xbf16>, vector<8x16x4xbf16>, vector<8x16x4xbf16>, vector<8x16x4xbf16>, vector<8x16x4xbf16>, vector<8x16x4xbf16>, vector<8x16x4xbf16>, vector<8x16x4xbf16>, vector<8x16x4xbf16> -> vector<8x16x36xbf16>
    %39 = vector.shape_cast %38 : vector<8x16x36xbf16> to vector<128x36xbf16>
    %c0_30 = arith.constant 0 : index
    %c0_31 = arith.constant 0 : index
    %40 = vector.load %arg3[%c0_30, %c0_31] : memref<36x8xbf16, #tpu.memory_space<vmem>>, vector<36x8xbf16>
    %cst = arith.constant dense<0.000000e+00> : vector<128x8xf32>
    %41 = tpu.matmul %39, %40, %cst {dimension_numbers = #tpu.dot_dimension_numbers<[1], [0], [0], [1], [0, 0, 1, 1], [], []>} : vector<128x36xbf16>, vector<36x8xbf16>, vector<128x8xf32> -> vector<128x8xf32>
    %cst_32 = arith.constant dense<0.000000e+00> : vector<8xf32>
    %42 = vector.multi_reduction <add>, %41, %cst_32 [0] : vector<128x8xf32> to vector<8xf32>
    %43 = vector.shape_cast %42 : vector<8xf32> to vector<1x8xf32>
    %44 = arith.mulf %41, %41 : vector<128x8xf32>
    %cst_33 = arith.constant dense<0.000000e+00> : vector<8xf32>
    %45 = vector.multi_reduction <add>, %44, %cst_33 [0] : vector<128x8xf32> to vector<8xf32>
    %46 = vector.shape_cast %45 : vector<8xf32> to vector<1x8xf32>
    %47 = tpu.concatenate %43, %46 in 0 : vector<1x8xf32>, vector<1x8xf32> -> vector<2x8xf32>
    %c0_34 = arith.constant 0 : index
    %c0_35 = arith.constant 0 : index
    %c0_36 = arith.constant 0 : index
    %c0_37 = arith.constant 0 : index
    %48 = vector.load %arg5[%c0_34, %c0_35, %c0_36, %c0_37] : memref<1x1x2x8xf32, #tpu.memory_space<vmem>>, vector<1x1x2x8xf32>
    %49 = vector.shape_cast %48 : vector<1x1x2x8xf32> to vector<2x8xf32>
    %50 = vector.shape_cast %47 : vector<2x8xf32> to vector<1x1x2x8xf32>
    tpu.vector_store %arg5[%c0_34, %c0_35, %c0_36, %c0_37], %50 {strides = array<i32>} : memref<1x1x2x8xf32, #tpu.memory_space<vmem>>, vector<1x1x2x8xf32>,
    %51 = tpu.transpose %41, [1, 0] : vector<128x8xf32> -> vector<8x128xf32>
    %52 = arith.truncf %51 : vector<8x128xf32> to vector<8x128xbf16>
    %c0_38 = arith.constant 0 : index
    %c0_39 = arith.constant 0 : index
    %c0_40 = arith.constant 0 : index
    %53 = vector.load %arg4[%c0_38, %c0_39, %c0_40] : memref<1x8x128xbf16, #tpu.memory_space<vmem>>, vector<1x8x128xbf16>
    %54 = vector.shape_cast %53 : vector<1x8x128xbf16> to vector<8x128xbf16>
    %55 = vector.shape_cast %52 : vector<8x128xbf16> to vector<1x8x128xbf16>
    tpu.vector_store %arg4[%c0_38, %c0_39, %c0_40], %55 {strides = array<i32>} : memref<1x8x128xbf16, #tpu.memory_space<vmem>>, vector<1x8x128xbf16>,
    return
  }
  func.func @transform_0(%arg0: i32, %arg1: i32) -> (i32, i32, i32, i32) {
    %c0_i32 = arith.constant 0 : i32
    %c0_i32_0 = arith.constant 0 : i32
    %c0_i32_1 = arith.constant 0 : i32
    %c0_i32_2 = arith.constant 0 : i32
    return %arg0, %c0_i32, %c0_i32_0, %c0_i32_1 : i32, i32, i32, i32
  }
  func.func @transform_1(%arg0: i32, %arg1: i32) -> (i32, i32) {
    %c0_i32 = arith.constant 0 : i32
    %c0_i32_0 = arith.constant 0 : i32
    %c0_i32_1 = arith.constant 0 : i32
    return %c0_i32, %c0_i32_0 : i32, i32
  }
  func.func @transform_2(%arg0: i32, %arg1: i32) -> (i32, i32, i32) {
    %c0_i32 = arith.constant 0 : i32
    %c0_i32_0 = arith.constant 0 : i32
    return %arg0, %c0_i32, %arg1 : i32, i32, i32
  }
  func.func @transform_3(%arg0: i32, %arg1: i32) -> (i32, i32, i32, i32) {
    %c0_i32 = arith.constant 0 : i32
    %c0_i32_0 = arith.constant 0 : i32
    %c0_i32_1 = arith.constant 0 : i32
    return %arg0, %arg1, %c0_i32, %c0_i32_0 : i32, i32, i32, i32
  }
}

</mosaic_0001>

<bundles_post_ra>
// kernel: tpu_custom_call.1
= control target key start
LH: loop header
LB: loop body
LE: loop exit
PB: predicated region body
PF: predicated region fallthrough
CT: control target
= control target key end

     0   :  { %9 = vsyncpa [#allocation3], 0  ;;  %s2770_s0 = inlined_call_operand.vmem [shape: bf16[2,18,18,4], index: 0, kind: input, shape index: {}]   ;;  %s2771_s1 = inlined_call_operand.vmem [shape: bf16[36,8], index: 1, kind: input, shape index: {}]   ;;  %s2772_s2 = inlined_call_operand.hbm [shape: bf16[2,8,256], index: 2, kind: output, shape index: {0}]   ;;  %s2773_s3 = inlined_call_operand.hbm [shape: f32[2,2,2,8], index: 3, kind: output, shape index: {1}]  }
   0x1   :  { %11 = vsyncpa [#allocation3 + $0x1], 0 }
   0x2   :  { %12 = vsyncpa [#allocation5], 0 }
   0x3   :  { %14 = vsyncpa [#allocation5 + $0x1], 0  ;;  %s2143_s12 = smov 0   ;;  %s2145_s13 = smov 0  }
   0x4   :  { %s2147_s14 = smov 0   ;;  %s2149_s15 = smov 0  }
   0x5   :  { %s2151_s16 = smov 0   ;;  %s2153_s17 = smov 0  }
   0x6   :  { %s2155_s18 = smov 0   ;;  %s2157_s19 = smov 0  }
   0x7 LB: > { %s1613_s20 = sadd.s32 4294967295, %s2111_s19   ;;  %s1614_s21 = sadd.s32 4294967294, %s2111_s19   ;;  %s2111_s19 = sphi %s2157_s19, %s20_s19   ;;  %s2107_s18 = sphi %s2155_s18, %s2782_s18   ;;  %s2103_s17 = sphi %s2153_s17, %s2781_s17   ;;  %s2099_s16 = sphi %s2151_s16, %s2780_s16   ;;  %s2095_s15 = sphi %s2149_s15, %s2779_s15   ;;  %s2091_s14 = sphi %s2147_s14, %s2778_s14   ;;  %s2087_s13 = sphi %s2145_s13, %s2777_s13   ;;  %s2083_s12 = sphi %s2143_s12, %s2776_s12  }
   0x8   : > { %s29_s22 = sadd.s32 1, %s2103_s17  ;;  %s32_s23 = sadd.s32 1, %s2107_s18 }
   0x9   : > { %p30_p0 = scmp.ge.s32.totalorder %s29_s22, 2  ;;  %p98_p1 = scmp.ne.s32.totalorder %s2091_s14, %s2087_s13 }
   0xa   : > { %p99_p2 = scmp.eq.s32.totalorder %s1613_s20, 3  ;;  %p104_p5 = scmp.ne.s32.totalorder %s2087_s13, %s2083_s12 }
   0xb   : > { %s2784_s22 = smov (%p30_p0, %s29_s22), 0  ;;  %s2786_s23 = smov (!%p30_p0, %s32_s23), %s2107_s18 }
   0xc   : > { %s84_s24 = ssub.s32 %s2103_s17, %s2784_s22  ;;  %p2194_p3 = por %p99_p2, %p98_p1 }
   0xd   : > { %p34_p4 = scmp.ge.s32.totalorder %s2786_s23, 2  ;;  %p105_p6 = scmp.eq.s32.totalorder %s1614_s21, 3 }
   0xe   : > { %p1617_p7 = scmp.ge.s32.totalorder %s2111_s19, 1  ;;  %p162_p9 = scmp.lt.s32.totalorder %s2111_s19, 5 }
   0xf   : > { %s2788_s23 = smov (%p34_p4, %s2786_s23), 0  ;;  %p2203_p8 = por %p105_p6, %p104_p5 }
  0x10   : > { %s83_s27 = ssub.s32 %s2107_s18, %s2788_s23  ;;  %s88_s28 = sadd.s32 1, %s2091_s14 }
  0x11   : > { %s85_s29 = sor.u32 %s84_s24, %s83_s27  ;;  %p163_p10 = pnand %p1617_p7, %p162_p9 }
  0x12   : > { %p86_p11 = scmp.eq.s32.totalorder %s85_s29, 0  ;;  %p191_p12 = scmp.lt.s32.totalorder (!%p163_p10), %s2099_s16, 1  ;;  %vm506_vm0 = vcmask (!%p163_p10), 1046528   ;;  %vm369_vm1 = vsmask.f32 (!%p163_p10), 7424  ;;  %v1982_v57 = vld [vmem:[%s2771_s1] sm:$0xff] (!%p163_p10)  }
  0x13   : > { %166 = sbr.rel (%p163_p10) target bundleno = 590 (0x24e), region = 28  ;;  %s2113_s11 = smov (!%p163_p10), 12   ;;  %1795 = vmatprep.subr.bf16.mxu0 (!%p163_p10), %v1982_v57  ;;  %1817 = vmatprep.subr.bf16.mxu1 (!%p163_p10), %v1982_v57  ;;  %vm1232_vm2 = vcmask (!%p163_p10), 1041408   ;;  %vm1059_vm3 = vcmask (!%p163_p10), 31744   ;;  %vm1076_vm4 = vcmask (!%p163_p10), 64512   ;;  %vm1093_vm5 = vcmask (!%p163_p10), 97280  }
  0x14   : > { %s2212_s30 = scalar_select %p86_p11, %s2091_s14, %s88_s28  }
  0x15   : > { %s1783_s5 = smul.u32 (!%p163_p10), 96, %s2095_s15  ;;  %s2114_s20 = smov (!%p163_p10), 20   ;;  %1796 = vmatpush3.bf16.msra.mxu0 (!%p163_p10), %v1982_v57  ;;  %1820 = vmatpush3.bf16.msra.mxu1 (!%p163_p10), %v1982_v57  ;;  %vm1110_vm6 = vcmask (!%p163_p10), 130048   ;;  %vm1127_vm7 = vcmask (!%p163_p10), 162816   ;;  %vm1144_vm8 = vcmask (!%p163_p10), 195584   ;;  %vm1161_vm9 = vcmask (!%p163_p10), 228352  }
  0x16   : > { %s2115_s21 = smov (!%p163_p10), 8   ;;  %s2116_s28 = smov (!%p163_p10), 4   ;;  %vm1178_vm10 = vcmask (!%p163_p10), 261120   ;;  %vm1215_vm11 = vcmask (!%p163_p10), 293888   ;;  %vm1423_vm12 = vcmask (!%p163_p10), 1040384   ;;  %vm1425_vm13 = vcmask (!%p163_p10), 58368  }
  0x17   : > { %s2119_s7 = smov (!%p163_p10), 28   ;;  %s2120_s8 = smov (!%p163_p10), 32  }
  0x1a   : > { %s192_s4 = scalar_select %p191_p12, %s2099_s16, 1 }
  0x1c   : > { %s1825_s6 = smul.u32 216, %s192_s4 }
  0x1e   : > { %s195_s9 = scalar_lea.vmem %s2770_s0, %s1825_s6  ;;  %s2118_s6 = smov 24  }
  0x1f   : > { %s2220_s10 = scalar_lea.vmem %s195_s9, %s1783_s5  ;;  %s2117_s5 = smov 16  }
  0x20   : > { %v1628_v0 = vld [vmem:[%s2220_s10 + $0x18] sm:$0xf]  ;;  %v1629_v1 = vld [vmem:[%s2220_s10 + $0x1c] sm:$0xf]  ;;  %v1626_v5 = vld [vmem:[%s2220_s10 + $0xc] sm:$0xf] }
  0x21   : > { %v1651_v2 = vld [vmem:[%s2220_s10 + $0x18] sm:$0xe]  ;;  %v2225_v3 = vcombine.low %v1628_v0, %v1629_v1  ;;  %v1627_v6 = vld [vmem:[%s2220_s10 + $0x10] sm:$0xf]  ;;  %v1650_v7 = vld [vmem:[%s2220_s10 + $0xc] sm:$0xe] }
  0x22   : > { %v1733_v4 = vcombine.low %v1651_v2, %v1629_v1  ;;  %v2230_v8 = vcombine.low %v1626_v5, %v1627_v6  ;;  %v1732_v9 = vcombine.low %v1650_v7, %v1627_v6  ;;  %v2233_v10 = vld [vmem:[%s2220_s10 + $0x14] ss:$0 sps:$4 sm:$0x11]   ;;  %v202_v12 = vld [vmem:[%s2220_s10 + $0x4] sm:$0xf] }
  0x23   : > { %589 = vrot.lane.b32.xlu1 %v2225_v3, %s2113_s11  ;;  %v642_v11 = vshll.u32 %v2225_v3, 16  ;;  %v764_v15 = vrot.slane %v2233_v10, 1  ;;  %v225_v16 = vld [vmem:[%s2220_s10] sm:$0xe]  ;;  %v640_v21 = vshrl.u32 %v2225_v3, 16  ;;  %v635_v60 = vshll.u32 %v2233_v10, 16 }
  0x24   : > { %587 = vrot.lane.b32.xlu0 %v2230_v8, %s2113_s11  ;;  %v630_v13 = vshll.u32 %v2230_v8, 16  ;;  %v763_v14 = vrot.slane %v1732_v9, 1  ;;  %v766_v17 = vrot.slane %v1733_v4, 1  ;;  %v1915_v18 = vld [vmem:[%s2220_s10 + $0x8] ss:$0 sps:$4 sm:$0x11]   ;;  %v1708_v19 = vcombine.low %v225_v16, %v202_v12 }
  0x25   : > { %v201_v20 = vld [vmem:[%s2220_s10] sm:$0xf]  ;;  %v203_v24 = vld [vmem:[%s2220_s10 + $0xc] sm:$0xf]  ;;  %v204_v25 = vld [vmem:[%s2220_s10 + $0x10] sm:$0xf] }
  0x26   : > { %v765_v22 = vsel %vm506_vm0, %v763_v14, %v764_v15  ;;  %v2248_v23 = vcombine.low %v201_v20, %v202_v12  ;;  %v507_v26 = vrot.slane %v1708_v19, 1  ;;  %v508_v27 = vrot.slane %v1915_v18, 1  ;;  %v226_v28 = vld [vmem:[%s2220_s10 + $0xc] sm:$0xe]  ;;  %v1662_v43 = vld [vmem:[%s2220_s10 + $0x24] sm:$0xf] }
  0x27   : > { %v2253_v29 = vcombine.low %v203_v24, %v204_v25  ;;  %v378_v30 = vshll.u32 %v1915_v18, 16  ;;  %v1919_v31 = vld [vmem:[%s2220_s10 + $0x14] ss:$0 sps:$4 sm:$0x11]   ;;  %v1709_v32 = vcombine.low %v226_v28, %v204_v25  ;;  %v644_v35 = vrot.slane %v642_v11, 1  ;;  %v1983_v12 = vld [vmem:[%s2771_s1 + $0x8] sm:$0xff]  }
  0x28   : > { %787 = vrot.lane.b32.xlu0 %v765_v22, %s2114_s20  ;;  %v371_v33 = vshrl.u32 %v2248_v23, 16  ;;  %v373_v34 = vshll.u32 %v2248_v23, 16  ;;  %v509_v36 = vsel %vm506_vm0, %v507_v26, %v508_v27  ;;  %v1921_v38 = vld [vmem:[%s2220_s10 + $0x20] ss:$0 sps:$4 sm:$0x11]   ;;  %v511_v40 = vrot.slane %v1919_v31, 1  ;;  %1797 = vmatprep.subr.bf16.mxu0 %v1983_v12 }
  0x29   : > { %v380_v37 = vrot.slane %v378_v30, 1  ;;  %531 = vrot.lane.b32.xlu1 %v509_v36, %s2115_s21  ;;  %v510_v39 = vrot.slane %v1709_v32, 1  ;;  %v383_v42 = vshrl.u32 %v2253_v29, 16  ;;  %v767_v44 = vrot.slane %v1921_v38, 1  ;;  %v2266_v48 = vld [vmem:[%s2220_s10 + $0x28] sm:$0xf]  ;;  %1818 = vmatprep.subr.bf16.mxu1 %v1983_v12 }
  0x2a   : > { %v375_v41 = vrot.slane %v373_v34, 1  ;;  %v385_v45 = vshll.u32 %v2253_v29, 16  ;;  %v390_v46 = vshll.u32 %v1919_v31, 16  ;;  %v647_v47 = vshll.u32 %v1921_v38, 16  ;;  %v1660_v53 = vld [vmem:[%s2220_s10 + $0x18] sm:$0xf]  ;;  %1798 = vmatpush3.bf16.msra.mxu0 %v1983_v12  ;;  %1821 = vmatpush3.bf16.msra.mxu1 %v1983_v12 }
  0x2b   : > { %v512_v49 = vsel %vm506_vm0, %v510_v39, %v511_v40  ;;  %v628_v51 = vshrl.u32 %v2230_v8, 16  ;;  %v632_v52 = vrot.slane %v630_v13, 1  ;;  %v2272_v56 = vld [vmem:[%s2220_s10 + $0x1c] sm:$0xf]  ;;  %v645_v59 = vor.u32 %v644_v35, %v640_v21  ;;  %v1684_v6 = vld [vmem:[%s2220_s10 + $0x18] sm:$0xe] }
  0x2c   : > { %v376_v50 = vor.u32 %v375_v41, %v371_v33  ;;  %v387_v54 = vrot.slane %v385_v45, 1  ;;  %v392_v55 = vrot.slane %v390_v46, 1  ;;  %v1741_v61 = vcombine.low %v1662_v43, %v2266_v48  ;;  %v2285_v2 = vld [vmem:[%s2220_s10 + $0x2c] ss:$0 sps:$4 sm:$0x11]  }
  0x2d   : > { %533 = vrot.lane.b32.xlu1 %v512_v49, %s2115_s21  ;;  %v768_v62 = vsel %vm506_vm0, %v766_v17, %v767_v44  ;;  %v649_v0 = vrot.slane %v647_v47, 1  ;;  %v1740_v1 = vcombine.low %v1660_v53, %v2272_v56  ;;  %v633_v3 = vor.u32 %v632_v52, %v628_v51  ;;  %v2289_v7 = vld [vmem:[%s2220_s10 + $0x20] ss:$0 sps:$4 sm:$0x11]   ;;  %v205_v11 = vld [vmem:[%s2220_s10 + $0x18] sm:$0xf] }
  0x2e   : > { %v381_v58 = vsel %vm369_vm1, %v376_v50, %v380_v37  ;;  %v388_v63 = vor.u32 %v387_v54, %v383_v42  ;;  %v637_v4 = vrot.slane %v635_v60, 1  ;;  %v898_v5 = vshll.u32 %v1741_v61, 16  ;;  %v2299_v15 = vld [vmem:[%s2220_s10 + $0x1c] sm:$0xf]  ;;  %v207_v24 = vld [vmem:[%s2220_s10 + $0x24] sm:$0xf] }
  0x2f   : > { %466 = vrot.lane.b32.xlu0 %v381_v58, %s2116_s28  ;;  %v886_v9 = vshll.u32 %v1740_v1, 16  ;;  %v896_v10 = vshrl.u32 %v1741_v61, 16  ;;  %v903_v14 = vshll.u32 %v2285_v2, 16  ;;  %v650_v16 = vsel %vm369_vm1, %v645_v59, %v649_v0  ;;  %v2307_v19 = vld [vmem:[%s2220_s10 + $0x20] ss:$0 sps:$4 sm:$0x11]  }
  0x30   : > { %v393_v8 = vsel %vm369_vm1, %v388_v63, %v392_v55  ;;  %v900_v13 = vrot.slane %v898_v5, 1  ;;  %v884_v17 = vshrl.u32 %v1740_v1, 16  ;;  %v2304_v18 = vcombine.low %v205_v11, %v2299_v15  ;;  %v208_v25 = vld [vmem:[%s2220_s10 + $0x28] sm:$0xf]  ;;  %v1685_v39 = vld [vmem:[%s2220_s10 + $0x24] sm:$0xe] }
  0x31   : > { %789 = vrot.lane.b32.xlu1 %v768_v62, %s2114_s20  ;;  %v638_v20 = vsel %vm369_vm1, %v633_v3, %v637_v4  ;;  %v888_v21 = vrot.slane %v886_v9, 1  ;;  %v891_v22 = vshll.u32 %v2289_v7, 16  ;;  %v1756_v26 = vcombine.low %v1684_v6, %v2272_v56  ;;  %v1931_v35 = vld [vmem:[%s2220_s10 + $0x2c] ss:$0 sps:$4 sm:$0x11]  }
  0x32   : > { %v397_v27 = vshll.u32 %v2304_v18, 16  ;;  %v901_v28 = vor.u32 %v900_v13, %v896_v10  ;;  %v905_v30 = vrot.slane %v903_v14, 1  ;;  %v402_v31 = vshll.u32 %v2307_v19, 16  ;;  %v228_v44 = vld [vmem:[%s2220_s10 + $0x24] sm:$0xe] }
  0x33   : > { %468 = vrot.lane.b32.xlu0 %v393_v8, %s2116_s28  ;;  %v2317_v32 = vcombine.low %v207_v24, %v208_v25  ;;  %v395_v33 = vshrl.u32 %v2304_v18, 16  ;;  %v889_v36 = vor.u32 %v888_v21, %v884_v17  ;;  %v893_v37 = vrot.slane %v891_v22, 1  ;;  %v227_v50 = vld [vmem:[%s2220_s10 + $0x18] sm:$0xe]  ;;  %v1632_v53 = vld [vmem:[%s2220_s10 + $0x30] sm:$0xf] }
  0x34   : > { %v399_v34 = vrot.slane %v397_v27, 1  ;;  %v906_v40 = vsel %vm369_vm1, %v901_v28, %v905_v30  ;;  %v404_v41 = vrot.slane %v402_v31, 1  ;;  %v1019_v42 = vrot.slane %v1756_v26, 1  ;;  %v1633_v54 = vld [vmem:[%s2220_s10 + $0x34] sm:$0xf] }
  0x35   : > { %725 = vrot.lane.b32.xlu1 %v650_v16, %s2117_s5  ;;  %v409_v38 = vshll.u32 %v2317_v32, 16  ;;  %v1020_v43 = vrot.slane %v2289_v7, 1  ;;  %v407_v46 = vshrl.u32 %v2317_v32, 16  ;;  %v414_v49 = vshll.u32 %v1931_v35, 16  ;;  %v1630_v55 = vld [vmem:[%s2220_s10 + $0x24] sm:$0xf] }
  0x36   : > { %v400_v45 = vor.u32 %v399_v34, %v395_v33  ;;  %v1757_v51 = vcombine.low %v1685_v39, %v2266_v48  ;;  %v894_v52 = vsel %vm369_vm1, %v889_v36, %v893_v37  ;;  %v1631_v56 = vld [vmem:[%s2220_s10 + $0x28] sm:$0xf]  ;;  %v1711_v58 = vcombine.low %v228_v44, %v208_v25  ;;  %v2345_v3 = vld [vmem:[%s2220_s10 + $0x38] ss:$0 sps:$4 sm:$0x11]  }
  0x37   : > { %723 = vrot.lane.b32.xlu0 %v638_v20, %s2117_s5  ;;  %v411_v47 = vrot.slane %v409_v38, 1  ;;  %v1021_v57 = vsel %vm506_vm0, %v1019_v42, %v1020_v43  ;;  %v1719_v48 = vcombine.low %v1632_v53, %v1633_v54  ;;  %v1023_v63 = vrot.slane %v2285_v2, 1  ;;  %v1939_v11 = vld [vmem:[%s2220_s10 + $0x2c] ss:$0 sps:$4 sm:$0x11]  }
  0x38   : > { %v405_v59 = vsel %vm369_vm1, %v400_v45, %v404_v41  ;;  %v1022_v62 = vrot.slane %v1757_v51, 1  ;;  %v1710_v0 = vcombine.low %v227_v50, %v2299_v15  ;;  %v516_v5 = vrot.slane %v1711_v58, 1  ;;  %v1653_v12 = vld [vmem:[%s2220_s10 + $0x30] sm:$0xe]  ;;  %v1652_v13 = vld [vmem:[%s2220_s10 + $0x24] sm:$0xe] }
  0x39   : > { %845 = vrot.lane.b32.xlu1 %v1741_v61, %s2118_s6  ;;  %v412_v60 = vor.u32 %v411_v47, %v407_v46  ;;  %v416_v61 = vrot.slane %v414_v49, 1  ;;  %v517_v6 = vrot.slane %v1931_v35, 1  ;;  %v666_v7 = vshll.u32 %v1719_v48, 16  ;;  %v1666_v21 = vld [vmem:[%s2220_s10 + $0x3c] sm:$0xf] }
  0x3a   : > { %v1024_v2 = vsel %vm506_vm0, %v1022_v62, %v1023_v63  ;;  %v513_v8 = vrot.slane %v1710_v0, 1  ;;  %v514_v9 = vrot.slane %v2307_v19, 1  ;;  %v664_v14 = vshrl.u32 %v1719_v48, 16  ;;  %v2360_v22 = vld [vmem:[%s2220_s10 + $0x40] sm:$0xf] }
  0x3b   : > { %843 = vrot.lane.b32.xlu0 %v1740_v1, %s2118_s6  ;;  %v1718_v1 = vcombine.low %v1630_v55, %v1631_v56  ;;  %v417_v4 = vsel %vm369_vm1, %v412_v60, %v416_v61  ;;  %v671_v15 = vshll.u32 %v2345_v3, 16  ;;  %v518_v16 = vsel %vm506_vm0, %v516_v5, %v517_v6  ;;  %v1664_v26 = vld [vmem:[%s2220_s10 + $0x30] sm:$0xf]  ;;  %v1665_v27 = vld [vmem:[%s2220_s10 + $0x34] sm:$0xf] }
  0x3c   : > { %v668_v17 = vrot.slane %v666_v7, 1  ;;  %v515_v19 = vsel %vm506_vm0, %v513_v8, %v514_v9  ;;  %v659_v25 = vshll.u32 %v1939_v11, 16  ;;  %v1735_v28 = vcombine.low %v1653_v12, %v1633_v54  ;;  %v209_v38 = vld [vmem:[%s2220_s10 + $0x30] sm:$0xf]  ;;  %v2370_v39 = vld [vmem:[%s2220_s10 + $0x34] sm:$0xf] }
  0x3d   : > { %981 = vrot.lane.b32.xlu1 %v906_v40, %s2119_s7  ;;  %v654_v10 = vshll.u32 %v1718_v1, 16  ;;  %v652_v20 = vshrl.u32 %v1718_v1, 16  ;;  %v1734_v30 = vcombine.low %v1652_v13, %v1631_v56  ;;  %v1743_v31 = vcombine.low %v1666_v21, %v2360_v22  ;;  %v2375_v45 = vld [vmem:[%s2220_s10 + $0x44] ss:$0 sps:$4 sm:$0x11]  }
  0x3e   : > { %v669_v33 = vor.u32 %v668_v17, %v664_v14  ;;  %v673_v34 = vrot.slane %v671_v15, 1  ;;  %v1742_v35 = vcombine.low %v1664_v26, %v1665_v27  ;;  %v661_v37 = vrot.slane %v659_v25, 1  ;;  %v1945_v49 = vld [vmem:[%s2220_s10 + $0x38] ss:$0 sps:$4 sm:$0x11]  }
  0x3f   : > { %979 = vrot.lane.b32.xlu0 %v894_v52, %s2119_s7  ;;  %v656_v24 = vrot.slane %v654_v10, 1  ;;  %v772_v40 = vrot.slane %v1735_v28, 1  ;;  %v773_v41 = vrot.slane %v2345_v3, 1  ;;  %v769_v42 = vrot.slane %v1734_v30, 1  ;;  %v211_v52 = vld [vmem:[%s2220_s10 + $0x3c] sm:$0xf] }
  0x40   : > { %v770_v43 = vrot.slane %v1939_v11, 1  ;;  %v922_v44 = vshll.u32 %v1743_v31, 16  ;;  %v674_v46 = vsel %vm369_vm1, %v669_v33, %v673_v34  ;;  %v910_v47 = vshll.u32 %v1742_v35, 16  ;;  %v212_v53 = vld [vmem:[%s2220_s10 + $0x40] sm:$0xf] }
  0x41   : > { %470 = vrot.lane.b32.xlu1 %v405_v59, %s2116_s28  ;;  %v657_v36 = vor.u32 %v656_v24, %v652_v20  ;;  %v2381_v50 = vcombine.low %v209_v38, %v2370_v39  ;;  %v920_v54 = vshrl.u32 %v1743_v31, 16  ;;  %v927_v56 = vshll.u32 %v2375_v45, 16  ;;  %v1686_v59 = vld [vmem:[%s2220_s10 + $0x30] sm:$0xe]  ;;  %v230_v24 = vld [vmem:[%s2220_s10 + $0x3c] sm:$0xe] }
  0x42   : > { %v924_v55 = vrot.slane %v922_v44, 1  ;;  %v774_v58 = vsel %vm506_vm0, %v772_v40, %v773_v41  ;;  %v2395_v61 = vcombine.low %v211_v52, %v212_v53  ;;  %v908_v62 = vshrl.u32 %v1742_v35, 16  ;;  %v1949_v8 = vld [vmem:[%s2220_s10 + $0x44] ss:$0 sps:$4 sm:$0x11]  }
  0x43   : > { %1043 = vrot.lane.b32.xlu0 %v1021_v57, %s2120_s8  ;;  %v662_v51 = vsel %vm369_vm1, %v657_v36, %v661_v37  ;;  %v2389_v57 = vld [vmem:[%s2220_s10 + $0x38] ss:$0 sps:$4 sm:$0x11]   ;;  %v421_v60 = vshll.u32 %v2381_v50, 16  ;;  %v912_v63 = vrot.slane %v910_v47, 1  ;;  %v915_v0 = vshll.u32 %v1945_v49, 16 }
  0x44   : > { %v1758_v3 = vcombine.low %v1686_v59, %v1665_v27  ;;  %v929_v5 = vrot.slane %v927_v56, 1  ;;  %v426_v6 = vshll.u32 %v2389_v57, 16  ;;  %v419_v7 = vshrl.u32 %v2381_v50, 16  ;;  %v1637_v26 = vld [vmem:[%s2220_s10 + $0x4c] sm:$0xf] }
  0x45   : > { %472 = vrot.lane.b32.xlu1 %v417_v4, %s2116_s28  ;;  %v925_v4 = vor.u32 %v924_v55, %v920_v54  ;;  %v433_v9 = vshll.u32 %v2395_v61, 16  ;;  %v913_v10 = vor.u32 %v912_v63, %v908_v62  ;;  %v917_v11 = vrot.slane %v915_v0, 1  ;;  %v229_v27 = vld [vmem:[%s2220_s10 + $0x30] sm:$0xe]  ;;  %v1634_v28 = vld [vmem:[%s2220_s10 + $0x3c] sm:$0xf] }
  0x46   : > { %v428_v14 = vrot.slane %v426_v6, 1  ;;  %v1025_v15 = vrot.slane %v1758_v3, 1  ;;  %v431_v20 = vshrl.u32 %v2395_v61, 16  ;;  %v1635_v30 = vld [vmem:[%s2220_s10 + $0x40] sm:$0xf]  ;;  %v1713_v33 = vcombine.low %v230_v24, %v212_v53 }
  0x47   : > { %1045 = vrot.lane.b32.xlu0 %v1024_v2, %s2120_s8  ;;  %v423_v2 = vrot.slane %v421_v60, 1  ;;  %v930_v13 = vsel %vm369_vm1, %v925_v4, %v929_v5  ;;  %v435_v21 = vrot.slane %v433_v9, 1  ;;  %v918_v25 = vsel %vm369_vm1, %v913_v10, %v917_v11  ;;  %v1957_v53 = vld [vmem:[%s2220_s10 + $0x44] ss:$0 sps:$4 sm:$0x11]  }
  0x48   : > { %v1029_v40 = vrot.slane %v2375_v45, 1  ;;  %v1712_v41 = vcombine.low %v229_v27, %v2370_v39  ;;  %v522_v44 = vrot.slane %v1713_v33, 1  ;;  %v520_v39 = vrot.slane %v2389_v57, 1  ;;  %v1655_v54 = vld [vmem:[%s2220_s10 + $0x48] sm:$0xe] }
  0x49   : > { %537 = vrot.lane.b32.xlu1 %v518_v16, %s2115_s21  ;;  %v1026_v16 = vrot.slane %v1945_v49, 1  ;;  %v424_v17 = vor.u32 %v423_v2, %v419_v7  ;;  %v2427_v49 = vld [vmem:[%s2220_s10 + $0x50] ss:$0 sps:$4 sm:$0x11]   ;;  %v1670_v60 = vld [vmem:[%s2220_s10 + $0x54] sm:$0xf]  ;;  %v1737_v5 = vcombine.low %v1655_v54, %v1637_v26 }
  0x4a   : > { %v695_v59 = vshll.u32 %v2427_v49, 16  ;;  %v1654_v62 = vld [vmem:[%s2220_s10 + $0x3c] sm:$0xe]  ;;  %v1668_v3 = vld [vmem:[%s2220_s10 + $0x48] sm:$0xf]  ;;  %v776_v24 = vrot.slane %v1957_v53, 1 }
  0x4b   : > { %535 = vrot.lane.b32.xlu0 %v515_v19, %s2115_s21  ;;  %v438_v19 = vshll.u32 %v1949_v8, 16  ;;  %v429_v34 = vsel %vm369_vm1, %v424_v17, %v428_v14  ;;  %v1027_v38 = vsel %vm506_vm0, %v1025_v15, %v1026_v16  ;;  %v2445_v4 = vld [vmem:[%s2220_s10 + $0x4c] sm:$0xf]  ;;  %v1736_v7 = vcombine.low %v1654_v62, %v1635_v30  ;;  %v1984_v14 = vld [vmem:[%s2771_s1 + $0x10] ss:$0 sps:$4 sm:$0x33]  }
  0x4c   : > { %v1744_v11 = vcombine.low %v1668_v3, %v2445_v4  ;;  %v778_v15 = vrot.slane %v1737_v5, 1  ;;  %v779_v16 = vrot.slane %v2427_v49, 1  ;;  %1823 = vmatprep.subr.msk.bf16.mxu0 %vm1232_vm2, %v1984_v14  ;;  %1824 = vmatprep.subr.msk.bf16.mxu1 %vm1232_vm2, %v1984_v14  ;;  %v232_v3 = vld [vmem:[%s2220_s10 + $0x54] sm:$0xe] }
  0x4d   : > { %593 = vrot.lane.b32.xlu1 %v1719_v48, %s2113_s11  ;;  %v771_v48 = vsel %vm506_vm0, %v769_v42, %v770_v43  ;;  %v440_v36 = vrot.slane %v438_v19, 1  ;;  %v1720_v42 = vcombine.low %v1634_v28, %v1635_v30  ;;  %v775_v19 = vrot.slane %v1736_v7, 1  ;;  %v215_v28 = vld [vmem:[%s2220_s10 + $0x54] sm:$0xf]  ;;  %v2474_v30 = vld [vmem:[%s2220_s10 + $0x58] sm:$0xf] }
  0x4e   : > { %v934_v27 = vshll.u32 %v1744_v11, 16  ;;  %v1640_v7 = vld [vmem:[%s2220_s10 + $0x60] sm:$0xf] }
  0x4f   : > { %591 = vrot.lane.b32.xlu0 %v1718_v1, %s2113_s11  ;;  %v1687_v1 = vld [vmem:[%s2220_s10 + $0x3c] sm:$0xe]  ;;  %v678_v52 = vshll.u32 %v1720_v42, 16  ;;  %v676_v63 = vshrl.u32 %v1720_v42, 16 }
  0x50   : > { %v1759_v12 = vcombine.low %v1687_v1, %v2360_v22  ;;  %v1636_v22 = vld [vmem:[%s2220_s10 + $0x48] sm:$0xf]  ;;  %v683_v1 = vshll.u32 %v1957_v53, 16  ;;  %v1967_v53 = vld [vmem:[%s2220_s10 + $0x5c] ss:$0 sps:$4 sm:$0x11]  }
  0x51   : > { %729 = vrot.lane.b32.xlu1 %v674_v46, %s2117_s5  ;;  %v1721_v37 = vcombine.low %v1636_v22, %v1637_v26  ;;  %v523_v46 = vrot.slane %v1949_v8, 1  ;;  %v680_v0 = vrot.slane %v678_v52, 1  ;;  %v697_v8 = vrot.slane %v695_v59, 1 }
  0x52   : > { %v685_v10 = vrot.slane %v683_v1, 1  ;;  %v462_v1 = vshll.u32 %v1967_v53, 16 }
  0x53   : > { %727 = vrot.lane.b32.xlu0 %v662_v51, %s2117_s5  ;;  %v690_v47 = vshll.u32 %v1721_v37, 16  ;;  %v519_v51 = vrot.slane %v1712_v41, 1  ;;  %v688_v55 = vshrl.u32 %v1721_v37, 16  ;;  %v524_v56 = vsel %vm506_vm0, %v522_v44, %v523_v46  ;;  %v1688_v46 = vld [vmem:[%s2220_s10 + $0x48] sm:$0xe] }
  0x54   : > { %v681_v9 = vor.u32 %v680_v0, %v676_v63  ;;  %v777_v41 = vsel %vm506_vm0, %v775_v19, %v776_v24 }
  0x55   : > { %793 = vrot.lane.b32.xlu1 %v774_v58, %s2114_s20  ;;  %v692_v58 = vrot.slane %v690_v47, 1  ;;  %v521_v57 = vsel %vm506_vm0, %v519_v51, %v520_v39  ;;  %v1689_v47 = vld [vmem:[%s2220_s10 + $0x54] sm:$0xe] }
  0x56   : > { %v686_v26 = vsel %vm369_vm1, %v681_v9, %v685_v10  ;;  %v1639_v9 = vld [vmem:[%s2220_s10 + $0x58] sm:$0xf] }
  0x57   : > { %791 = vrot.lane.b32.xlu0 %v771_v48, %s2114_s20  ;;  %v2439_v48 = vld [vmem:[%s2220_s10 + $0x58] sm:$0xf]  ;;  %v693_v2 = vor.u32 %v692_v58, %v688_v55  ;;  %v1760_v55 = vcombine.low %v1688_v46, %v2445_v4 }
  0x58   : > { %v1745_v6 = vcombine.low %v1670_v60, %v2439_v48  ;;  %v1761_v59 = vcombine.low %v1689_v47, %v2439_v48  ;;  %v1674_v47 = vld [vmem:[%s2220_s10 + $0x6c] sm:$0xf] }
  0x59   : > { %849 = vrot.lane.b32.xlu1 %v1743_v31, %s2118_s6  ;;  %v1028_v31 = vrot.slane %v1759_v12, 1  ;;  %v213_v12 = vld [vmem:[%s2220_s10 + $0x48] sm:$0xf]  ;;  %v1031_v5 = vrot.slane %v1760_v55, 1 }
  0x5a   : > { %v946_v17 = vshll.u32 %v1745_v6, 16  ;;  %v944_v33 = vshrl.u32 %v1745_v6, 16  ;;  %v1034_v10 = vrot.slane %v1761_v59, 1 }
  0x5b   : > { %847 = vrot.lane.b32.xlu0 %v1742_v35, %s2118_s6  ;;  %v436_v35 = vor.u32 %v435_v21, %v431_v20  ;;  %v1030_v45 = vsel %vm506_vm0, %v1028_v31, %v1029_v40  ;;  %v2461_v20 = vld [vmem:[%s2220_s10 + $0x5c] ss:$0 sps:$4 sm:$0x11]   ;;  %v698_v21 = vsel %vm369_vm1, %v693_v2, %v697_v8  ;;  %v1234_v31 = vsel %vm1232_vm2, %v1984_v14, 0  ;;  %v1641_v2 = vld [vmem:[%s2220_s10 + $0x64] sm:$0xf] }
  0x5c   : > { %1800 = vmatpush3.bf16.msra.mxu0 %v1234_v31  ;;  %v2485_v40 = vcombine.low %v215_v28, %v2474_v30  ;;  %1822 = vmatpush3.bf16.msra.mxu1 %v1234_v31  ;;  %v1638_v8 = vld [vmem:[%s2220_s10 + $0x54] sm:$0xf] }
  0x5d   : > { %985 = vrot.lane.b32.xlu1 %v930_v13, %s2119_s7  ;;  %v441_v43 = vsel %vm369_vm1, %v436_v35, %v440_v36  ;;  %v2453_v13 = vld [vmem:[%s2220_s10 + $0x4c] sm:$0xf]  ;;  %v951_v35 = vshll.u32 %v2461_v20, 16  ;;  %v2479_v36 = vld [vmem:[%s2220_s10 + $0x50] ss:$0 sps:$4 sm:$0x11]   ;;  %v1722_v24 = vcombine.low %v1638_v8, %v1639_v9 }
  0x5e   : > { %v2469_v22 = vcombine.low %v213_v12, %v2453_v13  ;;  %v450_v51 = vshll.u32 %v2479_v36, 16  ;;  %v457_v54 = vshll.u32 %v2485_v40, 16  ;;  %v455_v63 = vshrl.u32 %v2485_v40, 16 }
  0x5f   : > { %983 = vrot.lane.b32.xlu0 %v918_v25, %s2119_s7  ;;  %v2466_v25 = vld [vmem:[%s2220_s10 + $0x50] ss:$0 sps:$4 sm:$0x11]  }
  0x60   : > { %v939_v44 = vshll.u32 %v2466_v25, 16  ;;  %v443_v39 = vshrl.u32 %v2469_v22, 16  ;;  %v459_v0 = vrot.slane %v457_v54, 1  ;;  %v1032_v48 = vrot.slane %v2466_v25, 1 }
  0x61   : > { %474 = vrot.lane.b32.xlu1 %v429_v34, %s2116_s28  ;;  %v948_v34 = vrot.slane %v946_v17, 1 }
  0x62   : > { %v941_v58 = vrot.slane %v939_v44, 1  ;;  %v460_v14 = vor.u32 %v459_v0, %v455_v63  ;;  %v1033_v17 = vsel %vm506_vm0, %v1031_v5, %v1032_v48 }
  0x63   : > { %1047 = vrot.lane.b32.xlu0 %v1027_v38, %s2120_s8  ;;  %v445_v38 = vshll.u32 %v2469_v22, 16  ;;  %v949_v49 = vor.u32 %v948_v34, %v944_v33  ;;  %v1975_v34 = vld [vmem:[%s2220_s10 + $0x5c] ss:$0 sps:$4 sm:$0x11]  }
  0x64   : > { %v782_v5 = vrot.slane %v1975_v34, 1 }
  0x65   : > { %476 = vrot.lane.b32.xlu1 %v441_v43, %s2116_s28  ;;  %v936_v43 = vrot.slane %v934_v27, 1  ;;  %v447_v52 = vrot.slane %v445_v38, 1 }
  0x67   : > { %1049 = vrot.lane.b32.xlu0 %v1030_v45, %s2120_s8  ;;  %v953_v45 = vrot.slane %v951_v35, 1  ;;  %v448_v62 = vor.u32 %v447_v52, %v443_v39  ;;  %v1673_v39 = vld [vmem:[%s2220_s10 + $0x64] sm:$0xf] }
  0x69   : > { %541 = vrot.lane.b32.xlu1 %v524_v56, %s2115_s21  ;;  %v954_v60 = vsel %vm369_vm1, %v949_v49, %v953_v45  ;;  %v1675_v49 = vld [vmem:[%s2220_s10 + $0x70] sm:$0xf]  ;;  %v1656_v45 = vld [vmem:[%s2220_s10 + $0x54] sm:$0xe] }
  0x6a   : > { %v1747_v55 = vcombine.low %v1674_v47, %v1675_v49 }
  0x6b   : > { %539 = vrot.lane.b32.xlu0 %v521_v57, %s2115_s21  ;;  %v452_v57 = vrot.slane %v450_v51, 1  ;;  %v1672_v51 = vld [vmem:[%s2220_s10 + $0x60] sm:$0xf] }
  0x6c   : > { %v970_v0 = vshll.u32 %v1747_v55, 16 }
  0x6d   : > { %597 = vrot.lane.b32.xlu1 %v1721_v37, %s2113_s11  ;;  %v780_v37 = vsel %vm506_vm0, %v778_v15, %v779_v16  ;;  %v453_v12 = vsel %vm369_vm1, %v448_v62, %v452_v57  ;;  %v464_v15 = vrot.slane %v462_v1, 1  ;;  %v1723_v16 = vcombine.low %v1640_v7, %v1641_v2  ;;  %v1980_v1 = vld [vmem:[%s2220_s10 + $0x74] ss:$0 sps:$4 sm:$0x11]  }
  0x6e   : > { %v1981_v7 = vld [vmem:[%s2220_s10 + $0x68] ss:$0 sps:$4 sm:$0x11]   ;;  %v972_v8 = vrot.slane %v970_v0, 1 }
  0x6f   : > { %595 = vrot.lane.b32.xlu0 %v1720_v42, %s2113_s11  ;;  %v932_v42 = vshrl.u32 %v1744_v11, 16  ;;  %v465_v27 = vsel %vm369_vm1, %v460_v14, %v464_v15  ;;  %v714_v28 = vshll.u32 %v1723_v16, 16  ;;  %v712_v38 = vshrl.u32 %v1723_v16, 16 }
  0x70   : > { %v963_v15 = vshll.u32 %v1981_v7, 16 }
  0x71   : > { %733 = vrot.lane.b32.xlu1 %v698_v21, %s2117_s5  ;;  %v937_v56 = vor.u32 %v936_v43, %v932_v42  ;;  %v1035_v21 = vrot.slane %v2461_v20, 1  ;;  %v526_v20 = vrot.slane %v2479_v36, 1  ;;  %v700_v43 = vshrl.u32 %v1722_v24, 16 }
  0x72   : > { %v707_v36 = vshll.u32 %v1975_v34, 16 }
  0x73   : > { %731 = vrot.lane.b32.xlu0 %v686_v26, %s2117_s5  ;;  %v942_v4 = vsel %vm369_vm1, %v937_v56, %v941_v58  ;;  %v529_v26 = vrot.slane %v1967_v53, 1  ;;  %v1036_v31 = vsel %vm506_vm0, %v1034_v10, %v1035_v21  ;;  %v1738_v56 = vcombine.low %v1656_v45, %v1639_v9 }
  0x74   : > { %v709_v59 = vrot.slane %v707_v36, 1  ;;  %v975_v9 = vshll.u32 %v1980_v1, 16 }
  0x75   : > { %797 = vrot.lane.b32.xlu1 %v780_v37, %s2114_s20  ;;  %v1657_v37 = vld [vmem:[%s2220_s10 + $0x60] sm:$0xe] }
  0x76   : > { %v1739_v52 = vcombine.low %v1657_v37, %v1641_v2  ;;  %v1038_v37 = vrot.slane %v1981_v7, 1 }
  0x77   : > { %795 = vrot.lane.b32.xlu0 %v777_v41, %s2114_s20  ;;  %v716_v41 = vrot.slane %v714_v28, 1  ;;  %v965_v28 = vrot.slane %v963_v15, 1 }
  0x78   : > { %v784_v62 = vrot.slane %v1739_v52, 1 }
  0x79   : > { %853 = vrot.lane.b32.xlu1 %v1745_v6, %s2118_s6  ;;  %v231_v6 = vld [vmem:[%s2220_s10 + $0x48] sm:$0xe]  ;;  %v717_v53 = vor.u32 %v716_v41, %v712_v38 }
  0x7a   : > { %v1714_v19 = vcombine.low %v231_v6, %v2453_v13  ;;  %v702_v13 = vshll.u32 %v1722_v24, 16  ;;  %v968_v6 = vshrl.u32 %v1747_v55, 16 }
  0x7b   : > { %851 = vrot.lane.b32.xlu0 %v1744_v11, %s2118_s6  ;;  %v1715_v11 = vcombine.low %v232_v3, %v2474_v30  ;;  %v1974_v30 = vld [vmem:[%s2220_s10 + $0x68] ss:$0 sps:$4 sm:$0x11]  }
  0x7c   : > { %v525_v33 = vrot.slane %v1714_v19, 1  ;;  %v719_v42 = vshll.u32 %v1974_v30, 16  ;;  %v704_v46 = vrot.slane %v702_v13, 1  ;;  %v785_v63 = vrot.slane %v1974_v30, 1 }
  0x7d   : > { %989 = vrot.lane.b32.xlu1 %v954_v60, %s2119_s7  ;;  %v528_v25 = vrot.slane %v1715_v11, 1  ;;  %v1746_v60 = vcombine.low %v1672_v51, %v1673_v39  ;;  %v1691_v11 = vld [vmem:[%s2220_s10 + $0x6c] sm:$0xe] }
  0x7e   : > { %v527_v44 = vsel %vm506_vm0, %v525_v33, %v526_v20  ;;  %v721_v54 = vrot.slane %v719_v42, 1  ;;  %v705_v58 = vor.u32 %v704_v46, %v700_v43  ;;  %v786_v2 = vsel %vm506_vm0, %v784_v62, %v785_v63 }
  0x7f   : > { %987 = vrot.lane.b32.xlu0 %v942_v4, %s2119_s7  ;;  %v530_v35 = vsel %vm506_vm0, %v528_v25, %v529_v26  ;;  %v781_v4 = vrot.slane %v1738_v56, 1  ;;  %v958_v48 = vshll.u32 %v1746_v60, 16  ;;  %v1763_v19 = vcombine.low %v1691_v11, %v1675_v49 }
  0x80   : > { %v722_v57 = vsel %vm369_vm1, %v717_v53, %v721_v54  ;;  %v710_v3 = vsel %vm369_vm1, %v705_v58, %v709_v59  ;;  %v977_v25 = vrot.slane %v975_v9, 1  ;;  %v1041_v20 = vrot.slane %v1980_v1, 1 }
  0x81   : > { %478 = vrot.lane.b32.xlu1 %v453_v12, %s2116_s28  ;;  %v783_v10 = vsel %vm506_vm0, %v781_v4, %v782_v5  ;;  %v956_v12 = vshrl.u32 %v1746_v60, 16  ;;  %v960_v14 = vrot.slane %v958_v48, 1  ;;  %v1040_v33 = vrot.slane %v1763_v19, 1 }
  0x83   : > { %1051 = vrot.lane.b32.xlu0 %v1033_v17, %s2120_s8  ;;  %v1042_v38 = vsel %vm506_vm0, %v1040_v33, %v1041_v20 }
  0x85   : > { %480 = vrot.lane.b32.xlu1 %v465_v27, %s2116_s28  ;;  %v961_v27 = vor.u32 %v960_v14, %v956_v12 }
  0x87   : > { %1053 = vrot.lane.b32.xlu0 %v1036_v31, %s2120_s8  ;;  %v966_v34 = vsel %vm369_vm1, %v961_v27, %v965_v28 }
  0x89   : > { %545 = vrot.lane.b32.xlu1 %v530_v35, %s2115_s21 }
  0x8b   : > { %543 = vrot.lane.b32.xlu0 %v527_v44, %s2115_s21 }
  0x8d   : > { %601 = vrot.lane.b32.xlu1 %v1723_v16, %s2113_s11  ;;  %v1690_v16 = vld [vmem:[%s2220_s10 + $0x60] sm:$0xe]  ;;  %s2674_s10 = sand.u32 1, %s2087_s13  }
  0x8e   : > { %v1762_v26 = vcombine.low %v1690_v16, %v1673_v39 }
  0x8f   : > { %599 = vrot.lane.b32.xlu0 %v1722_v24, %s2113_s11  ;;  %v973_v24 = vor.u32 %v972_v8, %v968_v6  ;;  %s1777_s11 = sshll.u32 %s2099_s16, 1 }
  0x90   : > { %v1037_v35 = vrot.slane %v1762_v26, 1  ;;  %s2679_s21 = sadd.s32 %s2095_s15, %s1777_s11  ;;  %s1467_s15 = scalar_lea.sflag [#allocation5], %s2674_s10 }
  0x91   : > { %737 = vrot.lane.b32.xlu1 %v722_v57, %s2117_s5  ;;  %v978_v31 = vsel %vm369_vm1, %v973_v24, %v977_v25  ;;  %s1780_s27 = sshll.u32 %s2679_s21, 5 }
  0x92   : > { %v1039_v42 = vsel %vm506_vm0, %v1037_v35, %v1038_v37 }
  0x93   : > { %735 = vrot.lane.b32.xlu0 %v710_v3, %s2117_s5  ;;  %s2685_s5 = scalar_lea.hbm %s2773_s3, %s1780_s27 }
  0x95   : > { %801 = vrot.lane.b32.xlu1 %v786_v2, %s2114_s20  ;;  %v590_v17 = vpop.permute.xlu1 %589 }
  0x96   : > { %v588_v21 = vpop.permute.xlu0 %587 }
  0x97   : > { %799 = vrot.lane.b32.xlu0 %v783_v10, %s2114_s20  ;;  %s1619_s20 = sshll.u32 %s2674_s10, 1 }
  0x98   : > { %s190_s28 = scalar_lea.vmem [#allocation4], %s1619_s20 }
  0x99   : > { %857 = vrot.lane.b32.xlu1 %v1747_v55, %s2118_s6  ;;  %s1497_s29 = sshll.u32 %s190_s28, 4  ;;  %s2687_s29 = int_to_ptr.vmem [resolvable:$true] %s1497_s29 }
  0x9a   : > { %v788_v30 = vpop.permute.xlu0 %787 }
  0x9b   : > { %855 = vrot.lane.b32.xlu0 %v1746_v60, %s2118_s6  ;;  %v532_v13 = vpop.permute.xlu1 %531  ;;  %s1985_s6 = scalar_lea.vmem %s2687_s29, 32 }
  0x9c   : > { %p1986_p13 = scmp.ne.s32.totalorder %s2687_s29, %s1985_s6 }
  0x9d   : > { %993 = vrot.lane.b32.xlu1 %v978_v31, %s2119_s7 }
  0x9e   : > { %p1987_p0 = pnand %p1986_p13, %p2194_p3 }
  0x9f   : > { %991 = vrot.lane.b32.xlu0 %v966_v34, %s2119_s7  ;;  %v534_v41 = vpop.permute.xlu1 %533  ;;  %s2121_s7 = smov [#allocation4]  }
  0xa0   : > { %p1988_p1 = pneg %p1987_p0 }
  0xa1   : > { %v467_v43 = vpop.permute.xlu0 %466  ;;  %1057 = vrot.lane.b32.xlu1 %v1042_v38, %s2120_s8 }
  0xa2   : > { %v1061_v47 = vsel %vm1059_vm3, %v2248_v23, %v467_v43 }
  0xa3   : > { %1055 = vrot.lane.b32.xlu0 %v1039_v42, %s2120_s8  ;;  %v790_v44 = vpop.permute.xlu1 %789  ;;  %v1078_v51 = vsel %vm1076_vm4, %v1061_v47, %v532_v13  ;;  %s1989_s8 = sshll.u32 %s2121_s7, 4  ;;  %s1990_s8 = int_to_ptr.vmem [resolvable:$false] %s1989_s8 }
  0xa4   : > { %v1095_v54 = vsel %vm1093_vm5, %v1078_v51, %v588_v21  ;;  %s1991_s9 = scalar_lea.vmem %s1990_s8, 64  ;;  %p1992_p2 = scmp.lt.s32.totalorder %s2687_s29, %s1990_s8 }
  0xa5   : > { %v469_v46 = vpop.permute.xlu0 %468  ;;  %p1993_p4 = scmp.lt.s32.totalorder %s1991_s9, %s1985_s6 }
  0xa6   : > { %v1063_v45 = vsel %vm1059_vm3, %v2253_v29, %v469_v46 }
  0xa7   : > { %v726_v36 = vpop.permute.xlu1 %725  ;;  %v1080_v53 = vsel %vm1076_vm4, %v1063_v45, %v534_v41  ;;  %p1994_p5 = por %p1993_p4, %p1992_p2 }
  0xa8   : > { %v1097_v23 = vsel %vm1093_vm5, %v1080_v53, %v590_v17 }
  0xa9   : > { %v724_v49 = vpop.permute.xlu0 %723  ;;  %v1114_v59 = vsel %vm1110_vm6, %v1097_v23, %v726_v36  ;;  %p1995_p6 = pnand %p1994_p5, %p1988_p1 }
  0xaa   : > { %v1112_v55 = vsel %vm1110_vm6, %v1095_v54, %v724_v49  ;;  %v1131_v1 = vsel %vm1127_vm7, %v1114_v59, %v790_v44 }
  0xab   : > { %v846_v39 = vpop.permute.xlu1 %845  ;;  %v1129_v29 = vsel %vm1127_vm7, %v1112_v55, %v788_v30 }
  0xac   : > { %v1148_v3 = vsel %vm1144_vm8, %v1131_v1, %v846_v39 }
  0xad   : > { %v844_v52 = vpop.permute.xlu0 %843 }
  0xae   : > { %v1146_v60 = vsel %vm1144_vm8, %v1129_v29, %v844_v52 }
  0xaf   : > { %v982_v56 = vpop.permute.xlu1 %981 }
  0xb0   : > { %v1165_v5 = vsel %vm1161_vm9, %v1148_v3, %v982_v56 }
  0xb1   : > { %v980_v58 = vpop.permute.xlu0 %979 }
  0xb2   : > { %v1163_v62 = vsel %vm1161_vm9, %v1146_v60, %v980_v58 }
  0xb3   : > { %v471_v57 = vpop.permute.xlu1 %470 }
  0xb4   : > { %v1065_v17 = vsel %vm1059_vm3, %v2304_v18, %v471_v57 }
  0xb5   : > { %v1044_v63 = vpop.permute.xlu0 %1043 }
  0xb6   : > { %v1180_v0 = vsel %vm1178_vm10, %v1163_v62, %v1044_v63 }
  0xb7   : > { %1801 = vmatprep.mubr.msk.bf16.mxu0 %vm1215_vm11, %v1180_v0  ;;  %v473_v4 = vpop.permute.xlu1 %472 }
  0xb8   : > { %v1067_v27 = vsel %vm1059_vm3, %v2317_v32, %v473_v4 }
  0xb9   : > { %v1046_v48 = vpop.permute.xlu0 %1045 }
  0xba   : > { %v1182_v7 = vsel %vm1178_vm10, %v1165_v5, %v1046_v48 }
  0xbb   : > { %1802 = vmatmul.mubr.msk.bf16.vlgmr.msra.gmra.mrb[0].mxu0 %vm1215_vm11, %v1182_v7  ;;  %v538_v2 = vpop.permute.xlu1 %537 }
  0xbc   : > { %v1084_v30 = vsel %vm1076_vm4, %v1067_v27, %v538_v2 }
  0xbd   : > { %v536_v6 = vpop.permute.xlu0 %535 }
  0xbe   : > { %v1082_v21 = vsel %vm1076_vm4, %v1065_v17, %v536_v6 }
  0xbf   : > { %v594_v8 = vpop.permute.xlu1 %593 }
  0xc0   : > { %v1101_v18 = vsel %vm1093_vm5, %v1084_v30, %v594_v8 }
  0xc1   : > { %v592_v9 = vpop.permute.xlu0 %591 }
  0xc2   : > { %v1099_v24 = vsel %vm1093_vm5, %v1082_v21, %v592_v9 }
  0xc3   : > { %v730_v10 = vpop.permute.xlu1 %729 }
  0xc4   : > { %v1118_v34 = vsel %vm1110_vm6, %v1101_v18, %v730_v10 }
  0xc5   : > { %v728_v11 = vpop.permute.xlu0 %727 }
  0xc6   : > { %v1116_v26 = vsel %vm1110_vm6, %v1099_v24, %v728_v11 }
  0xc7   : > { %v794_v12 = vpop.permute.xlu1 %793 }
  0xc8   : > { %v1135_v37 = vsel %vm1127_vm7, %v1118_v34, %v794_v12 }
  0xc9   : > { %v792_v14 = vpop.permute.xlu0 %791 }
  0xca   : > { %v1133_v28 = vsel %vm1127_vm7, %v1116_v26, %v792_v14 }
  0xcb   : > { %v850_v15 = vpop.permute.xlu1 %849 }
  0xcc   : > { %v1152_v32 = vsel %vm1144_vm8, %v1135_v37, %v850_v15 }
  0xcd   : > { %v848_v16 = vpop.permute.xlu0 %847 }
  0xce   : > { %v1150_v31 = vsel %vm1144_vm8, %v1133_v28, %v848_v16 }
  0xcf   : > { %v986_v19 = vpop.permute.xlu1 %985 }
  0xd0   : > { %v1169_v41 = vsel %vm1161_vm9, %v1152_v32, %v986_v19 }
  0xd1   : > { %v984_v25 = vpop.permute.xlu0 %983 }
  0xd2   : > { %v1167_v20 = vsel %vm1161_vm9, %v1150_v31, %v984_v25 }
  0xd3   : > { %v475_v33 = vpop.permute.xlu1 %474 }
  0xd4   : > { %v1069_v54 = vsel %vm1059_vm3, %v2381_v50, %v475_v33 }
  0xd5   : > { %v1048_v13 = vpop.permute.xlu0 %1047 }
  0xd6   : > { %v1184_v35 = vsel %vm1178_vm10, %v1167_v20, %v1048_v13 }
  0xd7   : > { %1805 = vmatprep.mubr.msk.bf16.mxu0 %vm1215_vm11, %v1184_v35  ;;  %v477_v38 = vpop.permute.xlu1 %476 }
  0xd8   : > { %v1071_v59 = vsel %vm1059_vm3, %v2395_v61, %v477_v38 }
  0xd9   : > { %v1050_v42 = vpop.permute.xlu0 %1049 }
  0xda   : > { %v1186_v43 = vsel %vm1178_vm10, %v1169_v41, %v1050_v42 }
  0xdb   : > { %1806 = vmatmul.mubr.msk.bf16.gmra.mrb[4].mxu0 %vm1215_vm11, %v1186_v43  ;;  %v542_v44 = vpop.permute.xlu1 %541 }
  0xdc   : > { %v1088_v57 = vsel %vm1076_vm4, %v1071_v59, %v542_v44 }
  0xdd   : > { %v540_v46 = vpop.permute.xlu0 %539 }
  0xde   : > { %v1086_v55 = vsel %vm1076_vm4, %v1069_v54, %v540_v46 }
  0xdf   : > { %v598_v36 = vpop.permute.xlu1 %597 }
  0xe0   : > { %v1105_v50 = vsel %vm1093_vm5, %v1088_v57, %v598_v36 }
  0xe1   : > { %v596_v47 = vpop.permute.xlu0 %595 }
  0xe2   : > { %v1103_v23 = vsel %vm1093_vm5, %v1086_v55, %v596_v47 }
  0xe3   : > { %v734_v49 = vpop.permute.xlu1 %733 }
  0xe4   : > { %v1122_v3 = vsel %vm1110_vm6, %v1105_v50, %v734_v49 }
  0xe5   : > { %v732_v45 = vpop.permute.xlu0 %731 }
  0xe6   : > { %v1120_v29 = vsel %vm1110_vm6, %v1103_v23, %v732_v45 }
  0xe7   : > { %v798_v51 = vpop.permute.xlu1 %797 }
  0xe8   : > { %v1139_v5 = vsel %vm1127_vm7, %v1122_v3, %v798_v51 }
  0xe9   : > { %v796_v39 = vpop.permute.xlu0 %795 }
  0xea   : > { %v1137_v60 = vsel %vm1127_vm7, %v1120_v29, %v796_v39 }
  0xeb   : > { %v854_v52 = vpop.permute.xlu1 %853 }
  0xec   : > { %v1156_v61 = vsel %vm1144_vm8, %v1139_v5, %v854_v52 }
  0xed   : > { %v852_v53 = vpop.permute.xlu0 %851 }
  0xee   : > { %v1154_v62 = vsel %vm1144_vm8, %v1137_v60, %v852_v53 }
  0xef   : > { %v990_v56 = vpop.permute.xlu1 %989 }
  0xf0   : > { %v1173_v7 = vsel %vm1161_vm9, %v1156_v61, %v990_v56 }
  0xf1   : > { %v988_v58 = vpop.permute.xlu0 %987 }
  0xf2   : > { %v1171_v0 = vsel %vm1161_vm9, %v1154_v62, %v988_v58 }
  0xf3   : > { %v479_v63 = vpop.permute.xlu1 %478 }
  0xf4   : > { %v1073_v24 = vsel %vm1059_vm3, %v2469_v22, %v479_v63 }
  0xf5   : > { %v1052_v1 = vpop.permute.xlu0 %1051 }
  0xf6   : > { %v1188_v4 = vsel %vm1178_vm10, %v1171_v0, %v1052_v1 }
  0xf7   : > { %1809 = vmatprep.mubr.msk.bf16.mxu1 %vm1215_vm11, %v1188_v4  ;;  %v481_v48 = vpop.permute.xlu1 %480 }
  0xf8   : > { %v1075_v19 = vsel %vm1059_vm3, %v2485_v40, %v481_v48 }
  0xf9   : > { %v1054_v2 = vpop.permute.xlu0 %1053 }
  0xfa   : > { %v1190_v6 = vsel %vm1178_vm10, %v1173_v7, %v1054_v2 }
  0xfb   : > { %1810 = vmatmul.mubr.msk.bf16.vlgmr.msra.gmra.mrb[0].mxu1 %vm1215_vm11, %v1190_v6  ;;  %v546_v8 = vpop.permute.xlu1 %545 }
  0xfc   : > { %v1092_v25 = vsel %vm1076_vm4, %v1075_v19, %v546_v8 }
  0xfd   : > { %v544_v9 = vpop.permute.xlu0 %543 }
  0xfe   : > { %v1090_v26 = vsel %vm1076_vm4, %v1073_v24, %v544_v9 }
  0xff   : > { %v602_v10 = vpop.permute.xlu1 %601 }
 0x100   : > { %v1109_v27 = vsel %vm1093_vm5, %v1092_v25, %v602_v10 }
 0x101   : > { %v600_v11 = vpop.permute.xlu0 %599 }
 0x102   : > { %v1107_v30 = vsel %vm1093_vm5, %v1090_v26, %v600_v11 }
 0x103   : > { %v738_v12 = vpop.permute.xlu1 %737 }
 0x104   : > { %v1126_v31 = vsel %vm1110_vm6, %v1109_v27, %v738_v12 }
 0x105   : > { %v736_v14 = vpop.permute.xlu0 %735 }
 0x106   : > { %v1124_v18 = vsel %vm1110_vm6, %v1107_v30, %v736_v14 }
 0x107   : > { %v802_v15 = vpop.permute.xlu1 %801 }
 0x108   : > { %v1143_v20 = vsel %vm1127_vm7, %v1126_v31, %v802_v15 }
 0x109   : > { %v800_v16 = vpop.permute.xlu0 %799 }
 0x10a   : > { %v1141_v40 = vsel %vm1127_vm7, %v1124_v18, %v800_v16 }
 0x10b   : > { %v858_v17 = vpop.permute.xlu1 %857 }
 0x10c   : > { %v1160_v22 = vsel %vm1144_vm8, %v1143_v20, %v858_v17 }
 0x10d   : > { %v856_v21 = vpop.permute.xlu0 %855 }
 0x10e   : > { %v1158_v13 = vsel %vm1144_vm8, %v1141_v40, %v856_v21 }
 0x10f   : > { %v994_v28 = vpop.permute.xlu1 %993 }
 0x110   : > { %v1177_v34 = vsel %vm1161_vm9, %v1160_v22, %v994_v28 }
 0x111   : > { %v992_v33 = vpop.permute.xlu0 %991 }
 0x112   : > { %v1175_v37 = vsel %vm1161_vm9, %v1158_v13, %v992_v33 }
 0x113   : > { %v1058_v35 = vpop.permute.xlu1 %1057 }
 0x114   : > { %v1194_v32 = vsel %vm1178_vm10, %v1177_v34, %v1058_v35 }
 0x115   : > { %v1056_v38 = vpop.permute.xlu0 %1055 }
 0x116   : > { %v1192_v41 = vsel %vm1178_vm10, %v1175_v37, %v1056_v38 }
 0x117   : > { %1813 = vmatprep.mubr.msk.bf16.mxu1 %vm1215_vm11, %v1192_v41 }
 0x118   : > { %1814 = vmatmul.mubr.msk.bf16.gmra.mrb[4].mxu1 %vm1215_vm11, %v1194_v32 }
 0x18e   : > { %v1803_v42 = vpop.f32.mrb[0].mxu0 }
 0x18f   : > { %v1270_v43 = vpop.f32.mrb[1].mxu0  ;;  %v1372_v47 = vmul.f32 %v1803_v42, %v1803_v42  ;;  %v1336_v52 = vsel %vm1076_vm4, %v1803_v42, 0.0 }
 0x190   : > { %v1370_v44 = vmul.f32 %v1270_v43, %v1270_v43  ;;  %1427 = vxpose.xlu0.b32.start [1/16] (narrow) %v1270_v43, 8  ;;  %v1804_v46 = vpop.f32.mrb[2].mxu0  ;;  %v1333_v49 = vsel %vm1076_vm4, %v1270_v43, 0.0 }
 0x191   : > { %v1273_v36 = vpop.f32.mrb[3].mxu0  ;;  %v1373_v54 = vmul.f32 %v1804_v46, %v1804_v46  ;;  %v1389_v58 = vsel %vm1076_vm4, %v1372_v47, 0.0  ;;  %v1338_v29 = vsel %vm1076_vm4, %v1804_v46, 0.0 }
 0x192   : > { %v1334_v45 = vsel %vm1076_vm4, %v1273_v36, 0.0  ;;  %v1371_v51 = vmul.f32 %v1273_v36, %v1273_v36  ;;  %v1386_v53 = vsel %vm1076_vm4, %v1370_v44, 0.0 }
 0x193   : > { %v1335_v39 = vadd.f32 %v1334_v45, %v1333_v49  ;;  %v1391_v57 = vsel %vm1076_vm4, %v1373_v54, 0.0 }
 0x194   : > { %v1387_v55 = vsel %vm1076_vm4, %v1371_v51, 0.0  ;;  %1428 = vxpose.xlu0.b32.cont [2/16] (narrow) %v1273_v36, 8 }
 0x195   : > { %v1337_v56 = vadd.f32 %v1336_v52, %v1335_v39  ;;  %v1388_v23 = vadd.f32 %v1387_v55, %v1386_v53 }
 0x197   : > { %v1390_v59 = vadd.f32 %v1389_v58, %v1388_v23  ;;  %v1339_v60 = vadd.f32 %v1338_v29, %v1337_v56 }
 0x198   : > { %1429 = vxpose.xlu0.b32.cont [3/16] (narrow) %v1803_v42, 8 }
 0x199   : > { %v1392_v62 = vadd.f32 %v1391_v57, %v1390_v59 }
 0x19c   : > { %1430 = vxpose.xlu0.b32.cont [4/16] (narrow) %v1804_v46, 8 }
 0x1ae   : > { %v1807_v63 = vpop.f32.mrb[4].mxu0 }
 0x1af   : > { %v1286_v50 = vpop.f32.mrb[5].mxu0  ;;  %v1376_v61 = vmul.f32 %v1807_v63, %v1807_v63  ;;  %v1344_v9 = vsel %vm1076_vm4, %v1807_v63, 0.0 }
 0x1b0   : > { %v1340_v0 = vsel %vm1076_vm4, %v1286_v50, 0.0  ;;  %v1374_v1 = vmul.f32 %v1286_v50, %v1286_v50  ;;  %1431 = vxpose.xlu0.b32.cont [5/16] (narrow) %v1286_v50, 8  ;;  %v1808_v3 = vpop.f32.mrb[6].mxu0 }
 0x1b1   : > { %v1341_v4 = vadd.f32 %v1340_v0, %v1339_v60  ;;  %v1289_v5 = vpop.f32.mrb[7].mxu0  ;;  %v1377_v10 = vmul.f32 %v1808_v3, %v1808_v3  ;;  %v1397_v15 = vsel %vm1076_vm4, %v1376_v61, 0.0  ;;  %v1346_v16 = vsel %vm1076_vm4, %v1808_v3, 0.0 }
 0x1b2   : > { %v1393_v48 = vsel %vm1076_vm4, %v1374_v1, 0.0  ;;  %v1342_v7 = vsel %vm1076_vm4, %v1289_v5, 0.0  ;;  %v1375_v2 = vmul.f32 %v1289_v5, %v1289_v5 }
 0x1b3   : > { %v1394_v6 = vadd.f32 %v1393_v48, %v1392_v62  ;;  %v1343_v8 = vadd.f32 %v1342_v7, %v1341_v4  ;;  %v1399_v19 = vsel %vm1076_vm4, %v1377_v10, 0.0 }
 0x1b4   : > { %v1395_v11 = vsel %vm1076_vm4, %v1375_v2, 0.0  ;;  %1432 = vxpose.xlu0.b32.cont [6/16] (narrow) %v1289_v5, 8 }
 0x1b5   : > { %v1345_v12 = vadd.f32 %v1344_v9, %v1343_v8  ;;  %v1396_v14 = vadd.f32 %v1395_v11, %v1394_v6 }
 0x1b7   : > { %v1398_v17 = vadd.f32 %v1397_v15, %v1396_v14  ;;  %v1347_v21 = vadd.f32 %v1346_v16, %v1345_v12 }
 0x1b8   : > { %1433 = vxpose.xlu0.b32.cont [7/16] (narrow) %v1807_v63, 8 }
 0x1b9   : > { %v1400_v24 = vadd.f32 %v1399_v19, %v1398_v17 }
 0x1bc   : > { %1434 = vxpose.xlu0.b32.cont [8/16] (narrow) %v1808_v3, 8 }
 0x1ce   : > { %v1811_v25 = vpop.f32.mrb[0].mxu1 }
 0x1cf   : > { %v1302_v26 = vpop.f32.mrb[1].mxu1  ;;  %v1380_v18 = vmul.f32 %v1811_v25, %v1811_v25  ;;  %v1352_v35 = vsel %vm1076_vm4, %v1811_v25, 0.0 }
 0x1d0   : > { %v1348_v27 = vsel %vm1076_vm4, %v1302_v26, 0.0  ;;  %v1378_v28 = vmul.f32 %v1302_v26, %v1302_v26  ;;  %1435 = vxpose.xlu0.b32.cont [9/16] (narrow) %v1302_v26, 8  ;;  %v1812_v30 = vpop.f32.mrb[2].mxu1 }
 0x1d1   : > { %v1349_v31 = vadd.f32 %v1348_v27, %v1347_v21  ;;  %v1305_v33 = vpop.f32.mrb[3].mxu1  ;;  %v1381_v37 = vmul.f32 %v1812_v30, %v1812_v30  ;;  %v1405_v42 = vsel %vm1076_vm4, %v1380_v18, 0.0  ;;  %v1354_v43 = vsel %vm1076_vm4, %v1812_v30, 0.0 }
 0x1d2   : > { %v1401_v20 = vsel %vm1076_vm4, %v1378_v28, 0.0  ;;  %v1350_v40 = vsel %vm1076_vm4, %v1305_v33, 0.0  ;;  %v1379_v22 = vmul.f32 %v1305_v33, %v1305_v33 }
 0x1d3   : > { %v1402_v13 = vadd.f32 %v1401_v20, %v1400_v24  ;;  %v1351_v34 = vadd.f32 %v1350_v40, %v1349_v31  ;;  %v1407_v36 = vsel %vm1076_vm4, %v1381_v37, 0.0 }
 0x1d4   : > { %v1403_v32 = vsel %vm1076_vm4, %v1379_v22, 0.0  ;;  %1436 = vxpose.xlu0.b32.cont [10/16] (narrow) %v1305_v33, 8 }
 0x1d5   : > { %v1353_v38 = vadd.f32 %v1352_v35, %v1351_v34  ;;  %v1404_v41 = vadd.f32 %v1403_v32, %v1402_v13 }
 0x1d7   : > { %v1406_v44 = vadd.f32 %v1405_v42, %v1404_v41  ;;  %v1355_v46 = vadd.f32 %v1354_v43, %v1353_v38 }
 0x1d8   : > { %1437 = vxpose.xlu0.b32.cont [11/16] (narrow) %v1811_v25, 8 }
 0x1d9   : > { %v1408_v47 = vadd.f32 %v1407_v36, %v1406_v44 }
 0x1dc   : > { %1438 = vxpose.xlu0.b32.cont [12/16] (narrow) %v1812_v30, 8 }
 0x1eb   : > { %v1815_v49 = vpop.f32.mrb[4].mxu1 }
 0x1ec   : > { %v1318_v45 = vpop.f32.mrb[5].mxu1  ;;  %v1384_v55 = vmul.f32 %v1815_v49, %v1815_v49  ;;  %v1360_v60 = vsel %vm1076_vm4, %v1815_v49, 0.0 }
 0x1ed   : > { %v1356_v51 = vsel %vm1076_vm4, %v1318_v45, 0.0  ;;  %v1382_v39 = vmul.f32 %v1318_v45, %v1318_v45  ;;  %1439 = vxpose.xlu0.b32.cont [13/16] (narrow) %v1318_v45, 8  ;;  %v1816_v52 = vpop.f32.mrb[6].mxu1 }
 0x1ee   : > { %v1357_v53 = vadd.f32 %v1356_v51, %v1355_v46  ;;  %v1321_v54 = vpop.f32.mrb[7].mxu1  ;;  %v1385_v57 = vmul.f32 %v1816_v52, %v1816_v52  ;;  %v1413_v0 = vsel %vm1076_vm4, %v1384_v55, 0.0  ;;  %v1362_v1 = vsel %vm1076_vm4, %v1816_v52, 0.0 }
 0x1ef   : > { %v1409_v56 = vsel %vm1076_vm4, %v1382_v39, 0.0  ;;  %v1358_v23 = vsel %vm1076_vm4, %v1321_v54, 0.0  ;;  %v1383_v58 = vmul.f32 %v1321_v54, %v1321_v54 }
 0x1f0   : > { %v1410_v29 = vadd.f32 %v1409_v56, %v1408_v47  ;;  %v1359_v59 = vadd.f32 %v1358_v23, %v1357_v53  ;;  %v1415_v5 = vsel %vm1076_vm4, %v1385_v57, 0.0 }
 0x1f1   : > { %v1411_v62 = vsel %vm1076_vm4, %v1383_v58, 0.0  ;;  %1440 = vxpose.xlu0.b32.cont [14/16] (narrow) %v1321_v54, 8 }
 0x1f2   : > { %v1361_v63 = vadd.f32 %v1360_v60, %v1359_v59  ;;  %v1412_v50 = vadd.f32 %v1411_v62, %v1410_v29 }
 0x1f4   : > { %v1363_v3 = vadd.f32 %v1362_v1, %v1361_v63  ;;  %v1414_v4 = vadd.f32 %v1413_v0, %v1412_v50 }
 0x1f5   : > { %1441 = vxpose.xlu0.b32.cont [15/16] (narrow) %v1815_v49, 8 }
 0x1f6   : > { %v1364_v61 = vrot.slane %v1363_v3, 4  ;;  %v1416_v48 = vadd.f32 %v1415_v5, %v1414_v4 }
 0x1f8   : > { %v1365_v7 = vadd.f32 %v1364_v61, %v1363_v3  ;;  %v1417_v2 = vrot.slane %v1416_v48, 4 }
 0x1f9   : > { %1442 = vxpose.xlu0.b32.end [16/16] (narrow) %v1816_v52, 8 }
 0x1fa   : > { %v1366_v6 = vrot.slane %v1365_v7, 2  ;;  %v1418_v8 = vadd.f32 %v1417_v2, %v1416_v48 }
 0x1fc   : > { %v1367_v9 = vadd.f32 %v1366_v6, %v1365_v7  ;;  %v1419_v10 = vrot.slane %v1418_v8, 2 }
 0x1fe   : > { %v1368_v11 = vrot.slane %v1367_v9, 1  ;;  %v1420_v12 = vadd.f32 %v1419_v10, %v1418_v8 }
 0x200   : > { %v1421_v14 = vrot.slane %v1420_v12, 1  ;;  %v1369_v15 = vadd.f32 %v1368_v11, %v1367_v9 }
 0x202   : > { %v1422_v16 = vadd.f32 %v1421_v14, %v1420_v12 }
 0x204   : > { %v1424_v17 = vsel %vm1423_vm12, %v1369_v15, %v1422_v16 }
 0x205   : > { %1426 = vst.msk [vmem:[%s190_s28] sm:$0x3] %vm1425_vm13, %v1424_v17 }
 0x206   : > { %1998 = shalt.err (!%p1995_p6)
}
 0x207   : > { %s1999_s24 = scalar_lea.hbm %s2685_s5, 32  ;;  %s2003_s27 = scalar_lea.hbm %s2773_s3, 128 }
 0x208   : > { %p2000_p7 = scmp.ne.s32.totalorder %s2685_s5, %s1999_s24  ;;  %p2004_p11 = scmp.lt.u32.totalorder %s2685_s5, %s2773_s3 }
 0x209   : > { %p2005_p12 = scmp.lt.u32.totalorder %s2003_s27, %s1999_s24  ;;  %p2007_p0 = scmp.lt.u32.totalorder %s1999_s24, %s2685_s5 }
 0x20a   : > { %p2001_p9 = pnand %p2000_p7, %p2194_p3 }
 0x20b   : > { %p2006_p13 = por %p2005_p12, %p2004_p11 }
 0x20c   : > { %p2002_p10 = pneg %p2001_p9 }
 0x20d   : > { %p2008_p1 = por %p2007_p0, %p2006_p13 }
 0x20f   : > { %p2009_p2 = pnand %p2008_p1, %p2002_p10 }
 0x211   : > { %2012 = shalt.err (!%p2009_p2)
}
 0x212   : > { %1827 = dma.vmem_to_hbm [thread:$0]  (%p2194_p3), %s2687_s29, 32, %s2685_s5, %s1467_s15  }
 0x213   : > { %s1618_s16 = sshll.u32 %s2674_s10, 2  ;;  %s1778_s6 = sshll.u32 %s2679_s21, 6 }
 0x214   : > { %s183_s7 = scalar_lea.vmem [#allocation2], %s1618_s16  ;;  %s2716_s11 = scalar_lea.hbm %s2772_s2, %s1778_s6 }
 0x215   : > { %s1482_s8 = sshll.u32 %s183_s7, 4  ;;  %s1462_s20 = scalar_lea.sflag [#allocation3], %s2674_s10  ;;  %s2718_s8 = int_to_ptr.vmem [resolvable:$true] %s1482_s8 }
 0x216   : > { %s2013_s27 = scalar_lea.vmem %s2718_s8, 64  ;;  %s2122_s21 = smov [#allocation2]  }
 0x217   : > { %p2014_p4 = scmp.ne.s32.totalorder %s2718_s8, %s2013_s27  ;;  %s2017_s29 = sshll.u32 %s2122_s21, 4  ;;  %s2018_s29 = int_to_ptr.vmem [resolvable:$false] %s2017_s29 }
 0x218   : > { %s2019_s5 = scalar_lea.vmem %s2018_s29, 128  ;;  %p2020_p7 = scmp.lt.s32.totalorder %s2718_s8, %s2018_s29 }
 0x219   : > { %p2015_p5 = pnand %p2014_p4, %p2194_p3  ;;  %p2021_p9 = scmp.lt.s32.totalorder %s2019_s5, %s2013_s27 }
 0x21b   : > { %p2016_p6 = pneg %p2015_p5  ;;  %p2022_p10 = por %p2021_p9, %p2020_p7 }
 0x21d   : > { %p2023_p11 = pnand %p2022_p10, %p2016_p6 }
 0x23d   : > { %v1443_v21 = vpop.trf.xlu0 }
 0x23e   : > { %v1459_v19 = vpack.c.bf16 %v1443_v21, %v1443_v21 }
 0x240   : > { %1460 = vst [vmem:[%s183_s7] sm:$0xf] %v1459_v19 }
 0x241   : > { %2026 = shalt.err (!%p2023_p11)
}
 0x242   : > { %s2027_s10 = scalar_lea.hbm %s2716_s11, 64  ;;  %s2031_s4 = scalar_lea.hbm %s2772_s2, 256 }
 0x243   : > { %p2028_p12 = scmp.ne.s32.totalorder %s2716_s11, %s2027_s10  ;;  %p2032_p1 = scmp.lt.u32.totalorder %s2716_s11, %s2772_s2 }
 0x244   : > { %p2033_p2 = scmp.lt.u32.totalorder %s2031_s4, %s2027_s10  ;;  %p2035_p5 = scmp.lt.u32.totalorder %s2027_s10, %s2716_s11 }
 0x245   : > { %p2029_p13 = pnand %p2028_p12, %p2194_p3 }
 0x246   : > { %p2034_p4 = por %p2033_p2, %p2032_p1 }
 0x247   : > { %p2030_p0 = pneg %p2029_p13 }
 0x248   : > { %p2036_p6 = por %p2035_p5, %p2034_p4 }
 0x24a   : > { %p2037_p7 = pnand %p2036_p6, %p2030_p0 }
 0x24c   : > { %2040 = shalt.err (!%p2037_p7)
}
 0x24d   : > { %1826 = dma.vmem_to_hbm [thread:$0]  (%p2194_p3), %s2718_s8, 64, %s2716_s11, %s1462_s20  }
 0x24e PF: > { %p1837_p9 = scmp.ge.s32.totalorder %s2111_s19, 2  ;;  %s1509_s7 = sand.u32 1, %s2083_s12  }
 0x24f   : > { %s1510_s9 = scalar_lea.sflag [#allocation3], %s1509_s7 }
 0x250   : > { %p1831_p10 = pnand %p1837_p9, %p2203_p8 }
 0x252   : > { %2074 = dma.done.wait (!%p1831_p10), %s1510_s9, 64  }
 0x253   : > { %2076 = vsyncadd (!%p1831_p10), %s1510_s9, 4294967232  ;;  %s1519_s24 = scalar_lea.sflag [#allocation5], %s1509_s7 }
 0x254   : > { %2078 = dma.done.wait (!%p1831_p10), %s1519_s24, 32  }
 0x255   : > { %2080 = vsyncadd (!%p1831_p10), %s1519_s24, 4294967264  ;;  %s20_s19 = sadd.s32 1, %s2111_s19   ;;  %s2776_s12 = smov %s2087_s13 }
 0x256   : > { %p17_p11 = scmp.ge.s32.totalorder %s20_s19, 6   ;;  %s2777_s13 = smov %s2091_s14 }
 0x257   : > { %s2778_s14 = smov %s2212_s30  ;;  %s2779_s15 = smov %s2103_s17 }
 0x258   : > { %s2780_s16 = smov %s2107_s18  ;;  %s2781_s17 = smov %s2784_s22 }
 0x259   : > { %s2782_s18 = smov %s2788_s23  ;;  %19 = sbr.rel (!%p17_p11) target bundleno = 7 (0x7), region = 83 }
 0x260   :  { %1524 = vsyncpa [#allocation3], 1 }
 0x261   :  { %1526 = vsyncpa [#allocation3 + $0x1], 1 }
 0x262   :  { %1527 = vsyncpa [#allocation5], 1 }
 0x263   :  { %1529 = vsyncpa [#allocation5 + $0x1], 1 }

</bundles_post_ra>
